<compile_context>
chip_gen: v7x
topology: tpu7x:2x2x1
jax: 0.10.0
libtpu: 0.0.40
codegen_flags: <defaults>
</compile_context>

<pallas_src>
import functools

import jax
import jax.numpy as jnp
from jax.experimental import pallas as pl
from jax.experimental.pallas import tpu as pltpu

# Deterministic ball parameter (PoincareBall curvature c; geoopt uses k = -c).
_C = 1.0
_SQRT_C = _C ** 0.5

# Below this M*N the Pallas grid is pure per-step overhead -> plain XLA.
_PALLAS_MIN_MN = 1024


def _cdiv(a, b):
    return -(-a // b)


def _round_up(x, m):
    return _cdiv(x, m) * m


def _choose_tile(size, max_tile, align):
    """Pick a tile (multiple of `align`, <= max_tile) and the padded size."""
    size_a = max(_round_up(size, align), align)
    n_tiles = _cdiv(size_a, max_tile)
    tile = _round_up(_cdiv(size_a, n_tiles), align)
    return tile, tile * n_tiles


def _wm_bmm_kernel(d, rhs_ref, w_ref, out_ref, acc_ref):
    """One (batch, M-tile) output block; N-reduction runs over grid axis 2.

    rhs_ref: (1, TN, W)  columns [0:d) = gamma*x, column d = gamma-1, rest 0.
    w_ref  : (1, TM, TN) weights.
    out_ref: (1, TM, W)  lane-dense output (only [:, :d] is meaningful).
    acc_ref: (TM, W) f32 accumulator scratch.
    """
    k = pl.program_id(2)

    @pl.when(k == 0)
    def _():
        acc_ref[...] = jnp.zeros_like(acc_ref)

    # Single fused matmul: nom and denom come out of one MXU pass.
    acc_ref[...] += jnp.dot(w_ref[0], rhs_ref[0],
                            preferred_element_type=jnp.float32)

    @pl.when(k == pl.num_programs(2) - 1)
    def _():
        prod = acc_ref[...]                                    # (TM, W) f32
        col = jax.lax.broadcasted_iota(jnp.int32, prod.shape, 1)
        denom = jnp.sum(jnp.where(col == d, prod, 0.0),
                        axis=-1, keepdims=True)                # (TM, 1)
        nom = jnp.where(col < d, prod, 0.0)                    # (TM, W)

        # clamp_abs(denom, 1e-10) with sign(0) treated as +1 (like geoopt)
        denom_c = jnp.where(denom >= 0.0,
                            jnp.maximum(denom, 1e-10),
                            jnp.minimum(denom, -1e-10))

        # Mobius scalar multiplication by 0.5 without materializing t = nom/denom:
        #   t_norm = ||nom|| / |denom|
        #   out    = nom * tanh(0.5*artanh(sqrt(c)*t_norm)) / (sqrt(c)*t_norm*denom)
        nom_norm = jnp.sqrt(jnp.sum(nom * nom, axis=-1, keepdims=True))
        t_norm = jnp.maximum(nom_norm / jnp.abs(denom_c), 1e-15)
        u = jnp.minimum(_SQRT_C * t_norm, 1.0 - 1e-6)
        # tanh(0.5 * artanh(u)) == u / (1 + sqrt(1 - u*u))
        scaled = u / ((1.0 + jnp.sqrt(1.0 - u * u)) * _SQRT_C)  # (TM, 1)
        factor = scaled / (t_norm * denom_c)                    # (TM, 1)

        out_ref[0] = (nom * factor).astype(out_ref.dtype)


def _wm_bmm_jax(value, weight):
    """Plain-JAX weighted_midpoint_bmm (reference + small-shape fallback)."""
    x = value.astype(jnp.float32)
    w = weight.astype(jnp.float32)
    x_sq = jnp.sum(x * x, axis=-1, keepdims=True)
    gamma = 2.0 / jnp.maximum(1.0 - _C * x_sq, 1e-15)
    denom = jnp.matmul(w, gamma - 1.0)
    nom = jnp.matmul(w, gamma * x)
    denom = jnp.where(denom >= 0.0, jnp.maximum(denom, 1e-10),
                      jnp.minimum(denom, -1e-10))
    t = nom / denom
    tn = jnp.maximum(jnp.linalg.norm(t, axis=-1, keepdims=True), 1e-15)
    u = jnp.minimum(_SQRT_C * tn, 1.0 - 1e-6)
    out = jnp.tanh(0.5 * jnp.arctanh(u)) / _SQRT_C * t / tn
    return out.astype(value.dtype)


def weighted_midpoint_bmm(value, weight, *, force_pallas=False):
    """Pallas-backed ball.weighted_midpoint_bmm(value, weight).

    value: (B, N, D) or (N, D);  weight: (B, M, N) or (M, N).
    returns (B, M, D) or (M, D).
    """
    squeeze = value.ndim == 2
    if squeeze:
        value, weight = value[None], weight[None]
    B, N, D = value.shape
    Bw, M, Nw = weight.shape
    assert B == Bw and N == Nw, (value.shape, weight.shape)

    # Tiny shapes (beam-decode path): the Pallas grid is pure overhead — use XLA.
    if not force_pallas and (M * N) < _PALLAS_MIN_MN:
        out = _wm_bmm_jax(value, weight)
        return out[0] if squeeze else out

    out_dtype = value.dtype
    # Feed the MXU bf16 only when both inputs are bf16; accumulate in f32.
    mm_dtype = (jnp.bfloat16
                if (value.dtype == jnp.bfloat16 and weight.dtype == jnp.bfloat16)
                else jnp.float32)

    # Precompute rhs = [gamma*x | gamma-1 | 0] once (not per M-tile), lane-padded.
    x = value.astype(jnp.float32)
    x_sq = jnp.sum(x * x, axis=-1, keepdims=True)
    gamma = 2.0 / jnp.maximum(1.0 - _C * x_sq, 1e-15)
    w_lanes = _round_up(D + 1, 128)
    rhs = jnp.concatenate(
        [gamma * x, gamma - 1.0,
         jnp.zeros((B, N, w_lanes - D - 1), jnp.float32)],
        axis=-1).astype(mm_dtype)

    tm, m_pad = _choose_tile(M, 512, 8)
    tn, n_pad = _choose_tile(N, 1024, 128)

    w = weight.astype(mm_dtype)
    if m_pad != M or n_pad != N:
        w = jnp.pad(w, ((0, 0), (0, m_pad - M), (0, n_pad - N)))
    if n_pad != N:
        rhs = jnp.pad(rhs, ((0, 0), (0, n_pad - N), (0, 0)))

    grid = (B, m_pad // tm, n_pad // tn)
    kernel = functools.partial(_wm_bmm_kernel, D)

    out = pl.pallas_call(
        kernel,
        out_shape=jax.ShapeDtypeStruct((B, m_pad, w_lanes), out_dtype),
        grid_spec=pltpu.PrefetchScalarGridSpec(
            num_scalar_prefetch=0,
            grid=grid,
            in_specs=[
                pl.BlockSpec((1, tn, w_lanes), lambda b, i, k: (b, k, 0)),
                pl.BlockSpec((1, tm, tn), lambda b, i, k: (b, i, k)),
            ],
            out_specs=pl.BlockSpec((1, tm, w_lanes), lambda b, i, k: (b, i, 0)),
            scratch_shapes=[pltpu.VMEM((tm, w_lanes), jnp.float32)],
        ),
        compiler_params=pltpu.CompilerParams(
            dimension_semantics=("parallel", "parallel", "arbitrary"),
            vmem_limit_bytes=48 * 1024 * 1024,
        ),
    )(rhs, w)

    out = out[:, :M, :D]
    return out[0] if squeeze else out


class PoincareBeamableMM:
    """JAX/Pallas port of geoopt_plusplus PoincareBeamableMM.forward."""

    def __init__(self, beam_size=None):
        self.beam_size = beam_size
        self.training = False  # module is an inference-time optimization

    def set_beam_size(self, beam_size):
        self.beam_size = beam_size

    def __call__(self, value, weight):
        if (not self.training and self.beam_size is not None
                and weight.ndim == 3 and weight.shape[1] == 1):
            bsz, beam = weight.shape[0], self.beam_size
            sz2 = weight.shape[2]
            nhu = value.shape[2]
            # weight[:, 0, :].unfold(0, beam, beam).transpose(2, 1) == reshape
            w = weight[:, 0, :].reshape(bsz // beam, beam, sz2)
            # value.unfold(0, beam, beam)[:, :, :, 0] == first of each beam group
            v = value.reshape(bsz // beam, beam, value.shape[1], nhu)[:, 0]
            if w.shape[0] == 1:
                output = weighted_midpoint_bmm(v[0], w[0])
            else:
                output = weighted_midpoint_bmm(v, w)
            return output.reshape(bsz, 1, -1)
        else:
            return weighted_midpoint_bmm(value, weight)


if __name__ == "__main__":
    key = jax.random.PRNGKey(0)

    # ---- beam-decode path (tiny shapes; dispatches to the XLA fallback) ----
    beam, groups, sz2, nhu = 2, 2, 8, 32
    bsz = beam * groups
    kv, kw, k2, k3 = jax.random.split(key, 4)
    v_raw = jax.random.normal(kv, (groups, sz2, nhu), dtype=jnp.float32)
    v_grp = 0.7 * v_raw / (1.0 + jnp.linalg.norm(v_raw, axis=-1, keepdims=True))
    value = jnp.repeat(v_grp, beam, axis=0)                    # (bsz, sz2, nhu)
    logits = jax.random.normal(kw, (bsz, 1, sz2), dtype=jnp.float32)
    weight = jax.nn.softmax(logits, axis=-1)                   # (bsz, 1, sz2)

    mm = PoincareBeamableMM(beam_size=beam)
    out_beam = jax.block_until_ready(mm(value, weight))
    assert out_beam.shape == (bsz, 1, nhu)
    w_ref = weight[:, 0, :].reshape(bsz // beam, beam, sz2)
    v_ref = value.reshape(bsz // beam, beam, sz2, nhu)[:, 0]
    ref_beam = _wm_bmm_jax(v_ref, w_ref).reshape(bsz, 1, nhu)
    assert jnp.allclose(out_beam, ref_beam, atol=1e-4, rtol=1e-4)

    mm_generic = PoincareBeamableMM(beam_size=None)
    out_generic = jax.block_until_ready(mm_generic(value, weight))
    ref_generic = _wm_bmm_jax(value, weight)
    assert jnp.allclose(out_generic, ref_generic, atol=1e-4, rtol=1e-4)

    # ---- Pallas path at a moderate shape (fused matmul, tiled grid) ----
    B2, M2, N2, D2 = 2, 128, 256, 48
    kv2, kw2 = jax.random.split(k2)
    v_raw = jax.random.normal(kv2, (B2, N2, D2), dtype=jnp.float32)
    val2 = 0.7 * v_raw / (1.0 + jnp.linalg.norm(v_raw, axis=-1, keepdims=True))
    w2 = jax.nn.softmax(
        jax.random.normal(kw2, (B2, M2, N2), dtype=jnp.float32), axis=-1)
    out2 = jax.block_until_ready(weighted_midpoint_bmm(val2, w2))
    ref2 = _wm_bmm_jax(val2, w2)
    assert out2.shape == (B2, M2, D2)
    # looser tol: Mosaic vs XLA matmul may use different f32 pass decompositions
    assert jnp.allclose(out2, ref2, atol=1e-3, rtol=1e-3)

    # ---- odd / unaligned shape forced through Pallas (exercises padding) ----
    B3, M3, N3, D3 = 3, 5, 37, 32
    kv3, kw3 = jax.random.split(k3)
    v_raw = jax.random.normal(kv3, (B3, N3, D3), dtype=jnp.float32)
    val3 = 0.7 * v_raw / (1.0 + jnp.linalg.norm(v_raw, axis=-1, keepdims=True))
    w3 = jax.nn.softmax(
        jax.random.normal(kw3, (B3, M3, N3), dtype=jnp.float32), axis=-1)
    out3 = jax.block_until_ready(
        weighted_midpoint_bmm(val3, w3, force_pallas=True))
    ref3 = _wm_bmm_jax(val3, w3)
    assert out3.shape == (B3, M3, D3)
    assert jnp.allclose(out3, ref3, atol=1e-3, rtol=1e-3)

    print("KERNEL_OK")
</pallas_src>

<mosaic_0001>
module attributes {stable_mosaic.version = 11 : i64} {
  func.func @_wm_bmm_kernel(%arg0: i32, %arg1: i32, %arg2: i32, %arg3: memref<1x256x128xf32, #tpu.memory_space<vmem>>, %arg4: memref<1x128x256xf32, #tpu.memory_space<vmem>>, %arg5: memref<1x128x128xf32, #tpu.memory_space<vmem>>, %arg6: memref<128x128xf32, #tpu.memory_space<vmem>>) attributes {dimension_semantics = [#tpu.dimension_semantics<parallel>, #tpu.dimension_semantics<parallel>, #tpu.dimension_semantics<arbitrary>], iteration_bounds = array<i64: 2, 1, 1>, scalar_prefetch = 0 : i64, scratch_operands = 1 : i64, tpu.core_type = #tpu.core_type<tc>, window_params = [{transform_indices = @transform_0, window_bounds = array<i64: 1, 256, 128>}, {transform_indices = @transform_1, window_bounds = array<i64: 1, 128, 256>}, {transform_indices = @transform_2, window_bounds = array<i64: 1, 128, 128>}]} {
    %c0_i32 = arith.constant 0 : i32
    %0 = arith.cmpi eq, %arg2, %c0_i32 : i32
    %1 = arith.extui %0 : i1 to i32
    %c0_i32_0 = arith.constant 0 : i32
    %2 = arith.cmpi ne, %1, %c0_i32_0 : i32
    scf.if %2 {
      %cst_12 = arith.constant 0.000000e+00 : f32
      %14 = vector.broadcast %cst_12 : f32 to vector<128x128xf32>
      %c0_13 = arith.constant 0 : index
      %c0_14 = arith.constant 0 : index
      %15 = vector.load %arg6[%c0_13, %c0_14] : memref<128x128xf32, #tpu.memory_space<vmem>>, vector<128x128xf32>
      tpu.vector_store %arg6[%c0_13, %c0_14], %14 {strides = array<i32>} : memref<128x128xf32, #tpu.memory_space<vmem>>, vector<128x128xf32>,
    } else {
    }
    %c0 = arith.constant 0 : index
    %c0_1 = arith.constant 0 : index
    %3 = vector.load %arg6[%c0, %c0_1] : memref<128x128xf32, #tpu.memory_space<vmem>>, vector<128x128xf32>
    %c0_2 = arith.constant 0 : index
    %c0_3 = arith.constant 0 : index
    %c0_4 = arith.constant 0 : index
    %4 = vector.load %arg4[%c0_2, %c0_3, %c0_4] : memref<1x128x256xf32, #tpu.memory_space<vmem>>, vector<1x128x256xf32>
    %5 = vector.shape_cast %4 : vector<1x128x256xf32> to vector<128x256xf32>
    %c0_5 = arith.constant 0 : index
    %c0_6 = arith.constant 0 : index
    %c0_7 = arith.constant 0 : index
    %6 = vector.load %arg3[%c0_5, %c0_6, %c0_7] : memref<1x256x128xf32, #tpu.memory_space<vmem>>, vector<1x256x128xf32>
    %7 = vector.shape_cast %6 : vector<1x256x128xf32> to vector<256x128xf32>
    %cst = arith.constant dense<0.000000e+00> : vector<128x128xf32>
    %8 = tpu.matmul %5, %7, %cst {dimension_numbers = #tpu.dot_dimension_numbers<[1], [0], [0], [1], [0, 0, 1, 1], [], []>} : vector<128x256xf32>, vector<256x128xf32>, vector<128x128xf32> -> vector<128x128xf32>
    %9 = arith.addf %3, %8 : vector<128x128xf32>
    %c0_8 = arith.constant 0 : index
    %c0_9 = arith.constant 0 : index
    %10 = vector.load %arg6[%c0_8, %c0_9] : memref<128x128xf32, #tpu.memory_space<vmem>>, vector<128x128xf32>
    tpu.vector_store %arg6[%c0_8, %c0_9], %9 {strides = array<i32>} : memref<128x128xf32, #tpu.memory_space<vmem>>, vector<128x128xf32>,
    %c0_i32_10 = arith.constant 0 : i32
    %11 = arith.cmpi eq, %arg2, %c0_i32_10 : i32
    %12 = arith.extui %11 : i1 to i32
    %c0_i32_11 = arith.constant 0 : i32
    %13 = arith.cmpi ne, %12, %c0_i32_11 : i32
    scf.if %13 {
      %c0_12 = arith.constant 0 : index
      %c0_13 = arith.constant 0 : index
      %14 = vector.load %arg6[%c0_12, %c0_13] : memref<128x128xf32, #tpu.memory_space<vmem>>, vector<128x128xf32>
      %15 = tpu.iota {dimensions = array<i32: 1>} : vector<128x128xi32>
      %c48_i32 = arith.constant 48 : i32
      %16 = vector.broadcast %c48_i32 : i32 to vector<128x128xi32>
      %17 = arith.cmpi eq, %15, %16 : vector<128x128xi32>
      %cst_14 = arith.constant 0.000000e+00 : f32
      %18 = vector.broadcast %cst_14 : f32 to vector<128x128xf32>
      %19 = arith.select %17, %14, %18 : vector<128x128xi1>, vector<128x128xf32>
      %cst_15 = arith.constant dense<0.000000e+00> : vector<128xf32>
      %20 = vector.multi_reduction <add>, %19, %cst_15 [1] : vector<128x128xf32> to vector<128xf32>
      %21 = vector.shape_cast %20 : vector<128xf32> to vector<128x1xf32>
      %c48_i32_16 = arith.constant 48 : i32
      %22 = vector.broadcast %c48_i32_16 : i32 to vector<128x128xi32>
      %23 = arith.cmpi slt, %15, %22 : vector<128x128xi32>
      %cst_17 = arith.constant 0.000000e+00 : f32
      %24 = vector.broadcast %cst_17 : f32 to vector<128x128xf32>
      %25 = arith.select %23, %14, %24 : vector<128x128xi1>, vector<128x128xf32>
      %cst_18 = arith.constant 0.000000e+00 : f32
      %26 = vector.broadcast %cst_18 : f32 to vector<128x1xf32>
      %27 = arith.cmpf oge, %21, %26 : vector<128x1xf32>
      %cst_19 = arith.constant 1.000000e-10 : f32
      %28 = vector.broadcast %cst_19 : f32 to vector<128x1xf32>
      %29 = arith.maximumf %21, %28 : vector<128x1xf32>
      %cst_20 = arith.constant -1.000000e-10 : f32
      %30 = vector.broadcast %cst_20 : f32 to vector<128x1xf32>
      %31 = arith.minimumf %21, %30 : vector<128x1xf32>
      %32 = arith.select %27, %29, %31 : vector<128x1xi1>, vector<128x1xf32>
      %33 = arith.mulf %25, %25 : vector<128x128xf32>
      %cst_21 = arith.constant dense<0.000000e+00> : vector<128xf32>
      %34 = vector.multi_reduction <add>, %33, %cst_21 [1] : vector<128x128xf32> to vector<128xf32>
      %35 = vector.shape_cast %34 : vector<128xf32> to vector<128x1xf32>
      %36 = math.sqrt %35 : vector<128x1xf32>
      %37 = math.absf %32 : vector<128x1xf32>
      %38 = arith.divf %36, %37 : vector<128x1xf32>
      %cst_22 = arith.constant 1.000000e-15 : f32
      %39 = vector.broadcast %cst_22 : f32 to vector<128x1xf32>
      %40 = arith.maximumf %38, %39 : vector<128x1xf32>
      %cst_23 = arith.constant 1.000000e+00 : f32
      %41 = vector.broadcast %cst_23 : f32 to vector<128x1xf32>
      %42 = arith.mulf %41, %40 : vector<128x1xf32>
      %cst_24 = arith.constant 0.999998986 : f32
      %43 = vector.broadcast %cst_24 : f32 to vector<128x1xf32>
      %44 = arith.minimumf %42, %43 : vector<128x1xf32>
      %45 = arith.mulf %44, %44 : vector<128x1xf32>
      %cst_25 = arith.constant 1.000000e+00 : f32
      %46 = vector.broadcast %cst_25 : f32 to vector<128x1xf32>
      %47 = arith.subf %46, %45 : vector<128x1xf32>
      %48 = math.sqrt %47 : vector<128x1xf32>
      %cst_26 = arith.constant 1.000000e+00 : f32
      %49 = vector.broadcast %cst_26 : f32 to vector<128x1xf32>
      %50 = arith.addf %49, %48 : vector<128x1xf32>
      %cst_27 = arith.constant 1.000000e+00 : f32
      %51 = vector.broadcast %cst_27 : f32 to vector<128x1xf32>
      %52 = arith.mulf %50, %51 : vector<128x1xf32>
      %53 = arith.divf %44, %52 : vector<128x1xf32>
      %54 = arith.mulf %40, %32 : vector<128x1xf32>
      %55 = arith.divf %53, %54 : vector<128x1xf32>
      %56 = vector.broadcast %55 : vector<128x1xf32> to vector<128x128xf32>
      %57 = arith.mulf %25, %56 : vector<128x128xf32>
      %c0_28 = arith.constant 0 : index
      %c0_29 = arith.constant 0 : index
      %c0_30 = arith.constant 0 : index
      %58 = vector.load %arg5[%c0_28, %c0_29, %c0_30] : memref<1x128x128xf32, #tpu.memory_space<vmem>>, vector<1x128x128xf32>
      %59 = vector.shape_cast %58 : vector<1x128x128xf32> to vector<128x128xf32>
      %60 = vector.shape_cast %57 : vector<128x128xf32> to vector<1x128x128xf32>
      tpu.vector_store %arg5[%c0_28, %c0_29, %c0_30], %60 {strides = array<i32>} : memref<1x128x128xf32, #tpu.memory_space<vmem>>, vector<1x128x128xf32>,
    } else {
    }
    return
  }
  func.func @transform_0(%arg0: i32, %arg1: i32, %arg2: i32) -> (i32, i32, i32) {
    %c0_i32 = arith.constant 0 : i32
    %c0_i32_0 = arith.constant 0 : i32
    return %arg0, %arg2, %c0_i32 : i32, i32, i32
  }
  func.func @transform_1(%arg0: i32, %arg1: i32, %arg2: i32) -> (i32, i32, i32) {
    %c0_i32 = arith.constant 0 : i32
    return %arg0, %arg1, %arg2 : i32, i32, i32
  }
  func.func @transform_2(%arg0: i32, %arg1: i32, %arg2: i32) -> (i32, i32, i32) {
    %c0_i32 = arith.constant 0 : i32
    %c0_i32_0 = arith.constant 0 : i32
    return %arg0, %arg1, %c0_i32 : i32, i32, i32
  }
}

</mosaic_0001>

<bundles_post_ra>
// kernel: tpu_custom_call.1
= control target key start
LH: loop header
LB: loop body
LE: loop exit
PB: predicated region body
PF: predicated region fallthrough
CT: control target
= control target key end

     0   :  { %7 = vsyncpa [#allocation4], 0  ;;  %s2882_s0 = inlined_call_operand.hbm [shape: f32[2,256,128], index: 0, kind: input, shape index: {}]   ;;  %s2883_s1 = inlined_call_operand.hbm [shape: f32[2,128,256], index: 1, kind: input, shape index: {}]   ;;  %s2884_s2 = inlined_call_operand.hbm [shape: f32[2,128,128], index: 2, kind: output, shape index: {}]  }
   0x1   :  { %9 = vsyncpa [#allocation4 + $0x1], 0 }
   0x2   :  { %10 = vsyncpa [#allocation7], 0 }
   0x3   :  { %12 = vsyncpa [#allocation7 + $0x1], 0 }
   0x4   :  { %13 = vsyncpa [#allocation5], 0 }
   0x5   :  { %15 = vsyncpa [#allocation5 + $0x1], 0  ;;  %s1869_s9 = smov 0   ;;  %s1871_s10 = smov 0  }
   0x6   :  { %s1873_s11 = smov 0   ;;  %s1875_s12 = smov 0  }
   0x7   :  { %s1877_s13 = smov 0   ;;  %s1879_s14 = smov 0  }
   0x8 LB: > { %s1314_s15 = sadd.s32 4294967295, %s1843_s14   ;;  %s1315_s16 = sadd.s32 4294967294, %s1843_s14   ;;  %s1843_s14 = sphi %s1879_s14, %s21_s14   ;;  %s1839_s13 = sphi %s1877_s13, %s2902_s13   ;;  %s1835_s12 = sphi %s1875_s12, %s2901_s12   ;;  %s1831_s11 = sphi %s1873_s11, %s2900_s11   ;;  %s1827_s10 = sphi %s1871_s10, %s2899_s10   ;;  %s1823_s9 = sphi %s1869_s9, %s2898_s9  }
   0x9   : > { %s40_s17 = sadd.s32 1, %s1839_s13  ;;  %s49_s18 = sadd.s32 1, %s1831_s11 }
   0xa   : > { %p42_p0 = scmp.ge.s32.totalorder %s40_s17, 2  ;;  %p56_p1 = scmp.ne.s32.totalorder %s1831_s11, %s1827_s10 }
   0xb   : > { %p57_p2 = scmp.eq.s32.totalorder %s1843_s14, 0  ;;  %p62_p3 = scmp.ne.s32.totalorder %s1827_s10, %s1823_s9 }
   0xc   : > { %s2904_s17 = smov (%p42_p0, %s40_s17), 0  ;;  %p63_p5 = scmp.eq.s32.totalorder %s1314_s15, 0 }
   0xd   : > { %p1910_p4 = por %p57_p2, %p56_p1  ;;  %s44_s20 = ssub.s32 %s1839_s13, %s2904_s17 }
   0xe   : > { %p118_p6 = scmp.eq.s32.totalorder %s1314_s15, 1  ;;  %p47_p7 = scmp.eq.s32.totalorder %s44_s20, 0 }
   0xf   : > { %p1916_p8 = por %p63_p5, %p62_p3  ;;  %p124_p10 = scmp.eq.s32.totalorder %s1315_s16, 1 }
  0x10   : > { %p1920_p9 = por %p118_p6, %p56_p1  ;;  %p1481_p13 = scmp.lt.s32.totalorder %s1843_s14, 2 }
  0x11   : > { %s2888_s21 = scalar_select %p1916_p8, 1, 0 }
  0x12   : > { %s2889_s22 = scalar_select %p1920_p9, 1, 0 }
  0x13   : > { %s1925_s23 = scalar_select %p47_p7, %s1831_s11, %s49_s18  }
  0x14   : > { %p1927_p11 = por %p124_p10, %p62_p3  ;;  %s1934_s25 = sand.u32 1, %s1831_s11  }
  0x15   : > { %s1318_s26 = sshll.u32 %s1934_s25, 8  ;;  %s1333_s27 = sshll.u32 %s1839_s13, 12 }
  0x16   : > { %s2890_s24 = scalar_select %p1927_p11, 1, 0 }
  0x17   : > { %s1943_s30 = scalar_lea.hbm %s2882_s0, %s1333_s27  ;;  %s148_s3 = scalar_lea.vmem [#allocation3], %s1318_s26 }
  0x18   : > { %s157_s4 = sshll.u32 %s148_s3, 4  ;;  %p1951_p0 = pnand %p1481_p13, %p1910_p4  ;;  %s1947_s4 = int_to_ptr.vmem [resolvable:$true] %s157_s4 }
  0x19   : > { %s145_s6 = scalar_lea.sflag [#allocation4], %s1934_s25  ;;  %s1697_s7 = scalar_lea.hbm %s1943_s30, 4096 }
  0x1a   : > { %p1698_p2 = scmp.ne.s32.totalorder %s1943_s30, %s1697_s7  ;;  %p1699_p3 = pneg %p1951_p0 }
  0x1b   : > { %s1702_s16 = scalar_lea.hbm %s2882_s0, 8192  ;;  %p1703_p4 = scmp.lt.u32.totalorder %s1943_s30, %s2882_s0 }
  0x1c   : > { %p1700_p5 = pnand %p1699_p3, %p1698_p2  ;;  %p1704_p7 = scmp.lt.u32.totalorder %s1702_s16, %s1697_s7 }
  0x1d   : > { %p1706_p13 = scmp.lt.u32.totalorder %s1697_s7, %s1943_s30 }
  0x1e   : > { %p1701_p6 = pneg %p1700_p5  ;;  %p1705_p10 = por %p1704_p7, %p1703_p4 }
  0x20   : > { %p1707_p12 = por %p1706_p13, %p1705_p10 }
  0x22   : > { %p1708_p1 = pnand %p1707_p12, %p1701_p6 }
  0x24   : > { %1711 = shalt.err (!%p1708_p1)
}
  0x25   : > { %s1712_s20 = scalar_lea.vmem %s1947_s4, 4096  ;;  %s1845_s28 = smov [#allocation3]  }
  0x26   : > { %p1713_p2 = scmp.ne.s32.totalorder %s1947_s4, %s1712_s20  ;;  %s1717_s29 = sshll.u32 %s1845_s28, 4  ;;  %s1718_s29 = int_to_ptr.vmem [resolvable:$false] %s1717_s29 }
  0x27   : > { %s1719_s3 = scalar_lea.vmem %s1718_s29, 8192  ;;  %p1720_p9 = scmp.lt.s32.totalorder %s1947_s4, %s1718_s29 }
  0x28   : > { %p1715_p5 = pnand %p1713_p2, %p1699_p3  ;;  %p1721_p4 = scmp.lt.s32.totalorder %s1719_s3, %s1712_s20 }
  0x2a   : > { %p1716_p11 = pneg %p1715_p5  ;;  %p1722_p7 = por %p1721_p4, %p1720_p9 }
  0x2c   : > { %p1723_p10 = pnand %p1722_p7, %p1716_p11 }
  0x2e   : > { %1726 = shalt.err (!%p1723_p10)
}
  0x2f   : > { %s1846_s7 = smov 128   ;;  %s1847_s8 = smov 8  }
  0x30   : > { %1473 = dma.hbm_to_vmem [thread:$0]  (!%p1951_p0), %s1943_s30, 4096, %s1947_s4, %s145_s6, %s1846_s7, %s1846_s7, %s1847_s8  }
  0x31   : > { %p191_p12 = scmp.lt.s32.totalorder %s1843_s14, 3  ;;  %s1990_s18 = scalar_lea.hbm %s2883_s1, %s1333_s27 }
  0x32   : > { %p2892_p9 = scmp.ge.s32.totalorder %s1843_s14, 1  ;;  %s171_s20 = scalar_lea.vmem [#allocation6], %s1318_s26 }
  0x33   : > { %s183_s28 = sshll.u32 %s171_s20, 4  ;;  %s168_s30 = scalar_lea.sflag [#allocation7], %s1934_s25  ;;  %s2000_s28 = int_to_ptr.vmem [resolvable:$true] %s183_s28 }
  0x34   : > { %p1994_p11 = pnand %p2892_p9, %p191_p12  ;;  %s1727_s4 = scalar_lea.hbm %s1990_s18, 4096 }
  0x35   : > { %p1728_p1 = scmp.ne.s32.totalorder %s1990_s18, %s1727_s4  ;;  %s1732_s29 = scalar_lea.hbm %s2883_s1, 8192 }
  0x36   : > { %p1733_p2 = scmp.lt.u32.totalorder %s1990_s18, %s2883_s1  ;;  %p1734_p5 = scmp.lt.u32.totalorder %s1732_s29, %s1727_s4 }
  0x37   : > { %p1730_p6 = pnand %p1728_p1, %p1699_p3  ;;  %p1736_p7 = scmp.lt.u32.totalorder %s1727_s4, %s1990_s18 }
  0x38   : > { %p1735_p4 = por %p1734_p5, %p1733_p2 }
  0x39   : > { %p1731_p13 = pneg %p1730_p6 }
  0x3a   : > { %p1737_p10 = por %p1736_p7, %p1735_p4 }
  0x3c   : > { %p1738_p12 = pnand %p1737_p10, %p1731_p13 }
  0x3e   : > { %1741 = shalt.err (!%p1738_p12)
}
  0x3f   : > { %s1742_s26 = scalar_lea.vmem %s2000_s28, 4096  ;;  %s1848_s8 = smov [#allocation6]  }
  0x40   : > { %p1743_p9 = scmp.ne.s32.totalorder %s2000_s28, %s1742_s26  ;;  %s1747_s15 = sshll.u32 %s1848_s8, 4  ;;  %s1748_s15 = int_to_ptr.vmem [resolvable:$false] %s1747_s15 }
  0x41   : > { %s1749_s16 = scalar_lea.vmem %s1748_s15, 8192  ;;  %p1750_p8 = scmp.lt.s32.totalorder %s2000_s28, %s1748_s15 }
  0x42   : > { %p1745_p1 = pnand %p1743_p9, %p1699_p3  ;;  %p1751_p2 = scmp.lt.s32.totalorder %s1749_s16, %s1742_s26 }
  0x44   : > { %p1746_p6 = pneg %p1745_p1  ;;  %p1752_p5 = por %p1751_p2, %p1750_p8 }
  0x46   : > { %p1753_p4 = pnand %p1752_p5, %p1746_p6 }
  0x48   : > { %1756 = shalt.err (!%p1753_p4)
}
  0x49   : > { %s1849_s20 = smov 256   ;;  %s1850_s4 = smov 16  }
  0x4a   : > { %1476 = dma.hbm_to_vmem [thread:$0]  (!%p1951_p0), %s1990_s18, 4096, %s2000_s28, %s168_s30, %s1849_s20, %s1849_s20, %s1850_s4  }
  0x4b   : > { %195 = sbr.rel (%p1994_p11) target bundleno = 663 (0x297), region = 28  ;;  %s2031_s27 = sand.u32 (!%p1994_p11), 1, %s1827_s10  }
  0x4c   : > { %s1325_s6 = sshll.u32 (!%p1994_p11), %s2031_s27, 8  ;;  %s198_s29 = scalar_lea.sflag (!%p1994_p11), [#allocation4], %s2031_s27 }
  0x4d   : > { %s2035_s3 = scalar_lea.vmem (!%p1994_p11), [#allocation3], %s1325_s6  ;;  %p2894_p8 = scmp.ne.s32.totalorder (!%p1994_p11), %s2888_s21, 0 }
  0x52   : > { %1810 = dma.done.wait (%p2894_p8), %s198_s29, 4096  }
  0x53   : > { %1812 = vsyncadd (%p2894_p8), %s198_s29, 4294963200  ;;  %s207_s25 = scalar_lea.sflag [#allocation7], %s2031_s27  ;;  %s2042_s5 = scalar_lea.vmem [#allocation6], %s1325_s6 }
  0x54   : > { %1814 = dma.done.wait (%p2894_p8), %s207_s25, 4096  }
  0x55   : > { %1816 = vsyncadd (%p2894_p8), %s207_s25, 4294963200  ;;  %v324_v0 = vld [vmem:[%s2035_s3 + $0x80] sm:$0xff]  ;;  %v325_v1 = vld [vmem:[%s2035_s3 + $0x88] sm:$0xff]  ;;  %s1327_s21 = sshll.u32 %s2031_s27, 7  ;;  %s1335_s19 = sshll.u32 %s1835_s12, 11 }
  0x56   : > { %v308_v2 = vld [vmem:[%s2035_s3] sm:$0xff]  ;;  %v1416_v3 = vpack.c.bf16 %v325_v1, %v324_v0  ;;  %v309_v4 = vld [vmem:[%s2035_s3 + $0x8] sm:$0xff]  ;;  %v326_v5 = vld [vmem:[%s2035_s3 + $0x90] sm:$0xff]  ;;  %s2533_s18 = scalar_lea.vmem [#allocation8], %s1327_s21  ;;  %s2829_s26 = scalar_lea.hbm %s2884_s2, %s1335_s19 }
  0x57   : > { %v327_v6 = vld [vmem:[%s2035_s3 + $0x98] sm:$0xff]  ;;  %v1418_v7 = vpack.c.bf16 %v309_v4, %v308_v2  ;;  %v310_v9 = vld [vmem:[%s2035_s3 + $0x10] sm:$0xff]  ;;  %v328_v11 = vld [vmem:[%s2035_s3 + $0xa0] sm:$0xff]  ;;  %s1196_s28 = sshll.u32 %s2533_s18, 4  ;;  %s1181_s12 = scalar_lea.sflag [#allocation5], %s2031_s27  ;;  %s2831_s28 = int_to_ptr.vmem [resolvable:$true] %s1196_s28 }
  0x58   : > { %v1420_v8 = vpack.c.bf16 %v327_v6, %v326_v5  ;;  %v311_v10 = vld [vmem:[%s2035_s3 + $0x18] sm:$0xff]  ;;  %1417 = vmatprep.subr.bf16.mxu0 %v1416_v3  ;;  %1448 = vmatprep.subr.bf16.mxu1 %v1416_v3  ;;  %v329_v12 = vld [vmem:[%s2035_s3 + $0xa8] sm:$0xff]  ;;  %v312_v15 = vld [vmem:[%s2035_s3 + $0x20] sm:$0xff]  ;;  %s1757_s8 = scalar_lea.vmem %s2831_s28, 2048  ;;  %p2895_p3 = scmp.ne.s32.totalorder %s2889_s22, 0 }
  0x59   : > { %1419 = vmatpush3.bf16.msra.mxu0 %v1418_v7  ;;  %1456 = vmatpush3.bf16.msra.mxu1 %v1418_v7  ;;  %v1422_v13 = vpack.c.bf16 %v311_v10, %v310_v9  ;;  %v1424_v14 = vpack.c.bf16 %v329_v12, %v328_v11  ;;  %v313_v16 = vld [vmem:[%s2035_s3 + $0x28] sm:$0xff]  ;;  %v330_v17 = vld [vmem:[%s2035_s3 + $0xb0] sm:$0xff]  ;;  %v331_v18 = vld [vmem:[%s2035_s3 + $0xb8] sm:$0xff]  ;;  %p1758_p0 = scmp.ne.s32.totalorder %s2831_s28, %s1757_s8  ;;  %s1851_s15 = smov [#allocation8]  }
  0x5a   : > { %1421 = vmatprep.subr.bf16.mxu0 %v1420_v8  ;;  %1449 = vmatprep.subr.bf16.mxu1 %v1420_v8  ;;  %v1426_v19 = vpack.c.bf16 %v313_v16, %v312_v15  ;;  %v1428_v20 = vpack.c.bf16 %v331_v18, %v330_v17  ;;  %v314_v21 = vld [vmem:[%s2035_s3 + $0x30] sm:$0xff]  ;;  %v315_v22 = vld [vmem:[%s2035_s3 + $0x38] sm:$0xff]  ;;  %v332_v23 = vld [vmem:[%s2035_s3 + $0xc0] sm:$0xff]  ;;  %v536_v16 = vlaneseq  ;;  %s1761_s16 = sshll.u32 %s1851_s15, 4  ;;  %s1762_s16 = int_to_ptr.vmem [resolvable:$false] %s1761_s16 }
  0x5b   : > { %v333_v24 = vld [vmem:[%s2035_s3 + $0xc8] sm:$0xff]  ;;  %v1430_v27 = vpack.c.bf16 %v315_v22, %v314_v21  ;;  %v316_v29 = vld [vmem:[%s2035_s3 + $0x40] sm:$0xff]  ;;  %v334_v31 = vld [vmem:[%s2035_s3 + $0xd0] sm:$0xff]  ;;  %p1759_p11 = pnand %p1758_p0, %p2895_p3  ;;  %s1763_s20 = scalar_lea.vmem %s1762_s16, 4096 }
  0x5c   : > { %v277_v25 = vld [vmem:[%s2042_s5 + $0x8] sm:$0xff]  ;;  %v1432_v28 = vpack.c.bf16 %v333_v24, %v332_v23  ;;  %v335_v32 = vld [vmem:[%s2035_s3 + $0xd8] sm:$0xff]  ;;  %v318_v35 = vld [vmem:[%s2035_s3 + $0x50] sm:$0xff]  ;;  %v2112_v17 = vand.u32 127, %v536_v16  ;;  %p1764_p7 = scmp.lt.s32.totalorder %s2831_s28, %s1762_s16  ;;  %p1765_p10 = scmp.lt.s32.totalorder %s1763_s20, %s1757_s8 }
  0x5d   : > { %1423 = vmatpush3.bf16.msra.mxu0 %v1422_v13  ;;  %1457 = vmatpush3.bf16.msra.mxu1 %v1422_v13  ;;  %v293_v26 = vld [vmem:[%s2042_s5 + $0x88] sm:$0xff]  ;;  %v1436_v34 = vpack.c.bf16 %v335_v32, %v334_v31  ;;  %v319_v36 = vld [vmem:[%s2035_s3 + $0x58] sm:$0xff]  ;;  %v336_v37 = vld [vmem:[%s2035_s3 + $0xe0] sm:$0xff]  ;;  %p1760_p13 = pneg %p1759_p11 }
  0x5e   : > { %1425 = vmatprep.subr.bf16.mxu0 %v1424_v14  ;;  %1450 = vmatprep.subr.bf16.mxu1 %v1424_v14  ;;  %v317_v30 = vld [vmem:[%s2035_s3 + $0x48] sm:$0xff]  ;;  %v1438_v39 = vpack.c.bf16 %v319_v36, %v318_v35  ;;  %v320_v41 = vld [vmem:[%s2035_s3 + $0x60] sm:$0xff]  ;;  %v338_v43 = vld [vmem:[%s2035_s3 + $0xf0] sm:$0xff]  ;;  %vm538_vm0 = vcmp.eq.s32.totalorder %v2112_v17, 48  ;;  %vm587_vm1 = vcmp.lt.s32.totalorder %v2112_v17, 48  ;;  %p1766_p12 = por %p1765_p10, %p1764_p7 }
  0x5f   : > { %404 = vmatprep.mubr.f32.mxu0 %v277_v25  ;;  %444 = vmatprep.mubr.f32.mxu1 %v293_v26  ;;  %v1434_v33 = vpack.c.bf16 %v317_v30, %v316_v29  ;;  %v337_v38 = vld [vmem:[%s2035_s3 + $0xe8] sm:$0xff]  ;;  %v339_v44 = vld [vmem:[%s2035_s3 + $0xf8] sm:$0xff]  ;;  %v322_v47 = vld [vmem:[%s2035_s3 + $0x70] sm:$0xff] }
  0x60   : > { %v1440_v40 = vpack.c.bf16 %v337_v38, %v336_v37  ;;  %v321_v42 = vld [vmem:[%s2035_s3 + $0x68] sm:$0xff]  ;;  %v1444_v46 = vpack.c.bf16 %v339_v44, %v338_v43  ;;  %v323_v48 = vld [vmem:[%s2035_s3 + $0x78] sm:$0xff]  ;;  %v276_v50 = vld [vmem:[%s2042_s5] sm:$0xff]  ;;  %p1767_p9 = pnand %p1766_p12, %p1760_p13 }
  0x61   : > { %1427 = vmatpush3.bf16.msra.mxu0 %v1426_v19  ;;  %1458 = vmatpush3.bf16.msra.mxu1 %v1426_v19  ;;  %v1442_v45 = vpack.c.bf16 %v321_v42, %v320_v41  ;;  %v1446_v49 = vpack.c.bf16 %v323_v48, %v322_v47  ;;  %v292_v51 = vld [vmem:[%s2042_s5 + $0x80] sm:$0xff]  ;;  %v295_v52 = vld [vmem:[%s2042_s5 + $0x98] sm:$0xff]  ;;  %v294_v54 = vld [vmem:[%s2042_s5 + $0x90] sm:$0xff] }
  0x62   : > { %1429 = vmatprep.subr.bf16.mxu0 %v1428_v20  ;;  %1451 = vmatprep.subr.bf16.mxu1 %v1428_v20  ;;  %v279_v53 = vld [vmem:[%s2042_s5 + $0x18] sm:$0xff]  ;;  %v278_v55 = vld [vmem:[%s2042_s5 + $0x10] sm:$0xff]  ;;  %v281_v56 = vld [vmem:[%s2042_s5 + $0x28] sm:$0xff] }
  0x63   : > { %v297_v57 = vld [vmem:[%s2042_s5 + $0xa8] sm:$0xff]  ;;  %v280_v58 = vld [vmem:[%s2042_s5 + $0x20] sm:$0xff]  ;;  %v283_v60 = vld [vmem:[%s2042_s5 + $0x38] sm:$0xff] }
  0x64   : > { %v296_v59 = vld [vmem:[%s2042_s5 + $0xa0] sm:$0xff]  ;;  %v299_v61 = vld [vmem:[%s2042_s5 + $0xb8] sm:$0xff]  ;;  %v282_v62 = vld [vmem:[%s2042_s5 + $0x30] sm:$0xff] }
  0x65   : > { %1431 = vmatpush3.bf16.msra.mxu0 %v1430_v27  ;;  %1459 = vmatpush3.bf16.msra.mxu1 %v1430_v27  ;;  %v298_v63 = vld [vmem:[%s2042_s5 + $0xb0] sm:$0xff]  ;;  %v285_v0 = vld [vmem:[%s2042_s5 + $0x48] sm:$0xff]  ;;  %v284_v2 = vld [vmem:[%s2042_s5 + $0x40] sm:$0xff] }
  0x66   : > { %1433 = vmatprep.subr.bf16.mxu0 %v1432_v28  ;;  %1452 = vmatprep.subr.bf16.mxu1 %v1432_v28  ;;  %v301_v1 = vld [vmem:[%s2042_s5 + $0xc8] sm:$0xff]  ;;  %v300_v3 = vld [vmem:[%s2042_s5 + $0xc0] sm:$0xff]  ;;  %v287_v4 = vld [vmem:[%s2042_s5 + $0x58] sm:$0xff] }
  0x67   : > { %v303_v5 = vld [vmem:[%s2042_s5 + $0xd8] sm:$0xff]  ;;  %v286_v6 = vld [vmem:[%s2042_s5 + $0x50] sm:$0xff]  ;;  %v289_v8 = vld [vmem:[%s2042_s5 + $0x68] sm:$0xff] }
  0x68   : > { %v302_v7 = vld [vmem:[%s2042_s5 + $0xd0] sm:$0xff]  ;;  %v305_v9 = vld [vmem:[%s2042_s5 + $0xe8] sm:$0xff]  ;;  %v288_v10 = vld [vmem:[%s2042_s5 + $0x60] sm:$0xff] }
  0x69   : > { %1435 = vmatpush3.bf16.msra.mxu0 %v1434_v33  ;;  %1460 = vmatpush3.bf16.msra.mxu1 %v1434_v33  ;;  %v304_v11 = vld [vmem:[%s2042_s5 + $0xe0] sm:$0xff]  ;;  %v291_v12 = vld [vmem:[%s2042_s5 + $0x78] sm:$0xff]  ;;  %v290_v14 = vld [vmem:[%s2042_s5 + $0x70] sm:$0xff] }
  0x6a   : > { %1437 = vmatprep.subr.bf16.mxu0 %v1436_v34  ;;  %1453 = vmatprep.subr.bf16.mxu1 %v1436_v34  ;;  %v307_v13 = vld [vmem:[%s2042_s5 + $0xf8] sm:$0xff]  ;;  %v306_v15 = vld [vmem:[%s2042_s5 + $0xf0] sm:$0xff] }
  0x6d   : > { %1439 = vmatpush3.bf16.msra.mxu0 %v1438_v39  ;;  %1461 = vmatpush3.bf16.msra.mxu1 %v1438_v39 }
  0x6e   : > { %1441 = vmatprep.subr.bf16.mxu0 %v1440_v40  ;;  %1454 = vmatprep.subr.bf16.mxu1 %v1440_v40 }
  0x71   : > { %1443 = vmatpush3.bf16.msra.mxu0 %v1442_v45  ;;  %1462 = vmatpush3.bf16.msra.mxu1 %v1442_v45 }
  0x72   : > { %1445 = vmatprep.subr.bf16.mxu0 %v1444_v46  ;;  %1455 = vmatprep.subr.bf16.mxu1 %v1444_v46 }
  0x75   : > { %1447 = vmatpush3.bf16.msra.mxu0 %v1446_v49  ;;  %1463 = vmatpush3.bf16.msra.mxu1 %v1446_v49 }
  0x78   : > { %405 = vmatmul.mubr.f32.vlgmr.msra.gmra.mrb[0].mxu0 %v276_v50  ;;  %445 = vmatmul.mubr.f32.vlgmr.msra.gmra.mrb[0].mxu1 %v292_v51 }
  0x79   : > { %449 = vmatprep.mubr.f32.mxu1 %v295_v52  ;;  %409 = vmatprep.mubr.f32.mxu0 %v279_v53 }
  0x7c   : > { %450 = vmatmul.mubr.f32.gmra.mrb[2].mxu1 %v294_v54  ;;  %410 = vmatmul.mubr.f32.gmra.mrb[2].mxu0 %v278_v55 }
  0x7d   : > { %414 = vmatprep.mubr.f32.mxu0 %v281_v56  ;;  %454 = vmatprep.mubr.f32.mxu1 %v297_v57 }
  0x80   : > { %415 = vmatmul.mubr.f32.gmra.mrb[4].mxu0 %v280_v58  ;;  %455 = vmatmul.mubr.f32.gmra.mrb[4].mxu1 %v296_v59 }
  0x81   : > { %419 = vmatprep.mubr.f32.mxu0 %v283_v60  ;;  %459 = vmatprep.mubr.f32.mxu1 %v299_v61 }
  0x84   : > { %420 = vmatmul.mubr.f32.gmra.mrb[6].mxu0 %v282_v62  ;;  %460 = vmatmul.mubr.f32.gmra.mrb[6].mxu1 %v298_v63 }
  0x85   : > { %424 = vmatprep.mubr.f32.mxu0 %v285_v0  ;;  %464 = vmatprep.mubr.f32.mxu1 %v301_v1 }
  0x88   : > { %425 = vmatmul.mubr.f32.gmra.mrb[8].mxu0 %v284_v2  ;;  %465 = vmatmul.mubr.f32.gmra.mrb[8].mxu1 %v300_v3 }
  0x89   : > { %429 = vmatprep.mubr.f32.mxu0 %v287_v4  ;;  %469 = vmatprep.mubr.f32.mxu1 %v303_v5 }
  0x8c   : > { %430 = vmatmul.mubr.f32.gmra.mrb[10].mxu0 %v286_v6  ;;  %470 = vmatmul.mubr.f32.gmra.mrb[10].mxu1 %v302_v7 }
  0x8d   : > { %434 = vmatprep.mubr.f32.mxu0 %v289_v8  ;;  %474 = vmatprep.mubr.f32.mxu1 %v305_v9 }
  0x90   : > { %435 = vmatmul.mubr.f32.gmra.mrb[12].mxu0 %v288_v10  ;;  %475 = vmatmul.mubr.f32.gmra.mrb[12].mxu1 %v304_v11 }
  0x91   : > { %439 = vmatprep.mubr.f32.mxu0 %v291_v12  ;;  %479 = vmatprep.mubr.f32.mxu1 %v307_v13 }
  0x94   : > { %440 = vmatmul.mubr.f32.gmra.mrb[14].mxu0 %v290_v14  ;;  %480 = vmatmul.mubr.f32.gmra.mrb[14].mxu1 %v306_v15 }
 0x14b   : > { %v1368_v18 = vpop.f32.mrb[0].mxu0  ;;  %v1392_v19 = vpop.f32.mrb[0].mxu1 }
 0x14c   : > { %v1369_v20 = vpop.f32.mrb[1].mxu0  ;;  %v1393_v21 = vpop.f32.mrb[1].mxu1 }
 0x14d   : > { %v1370_v22 = vadd.f32 %v1369_v20, %v1368_v18  ;;  %v1394_v23 = vadd.f32 %v1393_v21, %v1392_v19 }
 0x14f   : > { %v1395_v24 = vpop.f32.mrb[2].mxu1  ;;  %v1371_v25 = vpop.f32.mrb[2].mxu0  ;;  %v539_v26 = vsel %vm538_vm0, %v1370_v22, 0.0  ;;  %v547_v32 = vsel %vm538_vm0, %v1394_v23, 0.0  ;;  %v2128_v34 = vsel %vm587_vm1, %v1370_v22, 0.0  ;;  %v2140_v44 = vsel %vm587_vm1, %v1394_v23, 0.0 }
 0x150   : > { %v1396_v27 = vpop.f32.mrb[3].mxu1  ;;  %555 = vadd.xlane.f32.xlu0 %v539_v26  ;;  %v1372_v28 = vpop.f32.mrb[3].mxu0  ;;  %v668_v42 = vmul.f32 %v2128_v34, %v2128_v34  ;;  %v676_v52 = vmul.f32 %v2140_v44, %v2140_v44 }
 0x151   : > { %v1397_v29 = vadd.f32 %v1396_v27, %v1395_v24  ;;  %v1373_v30 = vadd.f32 %v1372_v28, %v1371_v25 }
 0x153   : > { %v548_v31 = vsel %vm538_vm0, %v1397_v29, 0.0  ;;  %v2124_v33 = vsel %vm587_vm1, %v1373_v30, 0.0  ;;  %v1374_v35 = vpop.f32.mrb[4].mxu0  ;;  %v1398_v36 = vpop.f32.mrb[4].mxu1  ;;  %v2136_v43 = vsel %vm587_vm1, %v1397_v29, 0.0  ;;  %v540_v60 = vsel %vm538_vm0, %v1373_v30, 0.0 }
 0x154   : > { %573 = vadd.xlane.f32.xlu1 %v548_v31  ;;  %571 = vadd.xlane.f32.xlu0 %v547_v32  ;;  %v669_v37 = vmul.f32 %v2124_v33, %v2124_v33  ;;  %v1375_v38 = vpop.f32.mrb[5].mxu0  ;;  %v1399_v39 = vpop.f32.mrb[5].mxu1  ;;  %v677_v51 = vmul.f32 %v2136_v43, %v2136_v43 }
 0x155   : > { %v1376_v40 = vadd.f32 %v1375_v38, %v1374_v35  ;;  %v1400_v41 = vadd.f32 %v1399_v39, %v1398_v36 }
 0x157   : > { %v1377_v45 = vpop.f32.mrb[6].mxu0  ;;  %v1401_v46 = vpop.f32.mrb[6].mxu1  ;;  %v541_v57 = vsel %vm538_vm0, %v1376_v40, 0.0  ;;  %v549_v2 = vsel %vm538_vm0, %v1400_v41, 0.0  ;;  %v2156_v5 = vsel %vm587_vm1, %v1376_v40, 0.0  ;;  %v2168_v15 = vsel %vm587_vm1, %v1400_v41, 0.0 }
 0x158   : > { %686 = vadd.xlane.f32.xlu1 %v669_v37  ;;  %684 = vadd.xlane.f32.xlu0 %v668_v42  ;;  %v1378_v47 = vpop.f32.mrb[7].mxu0  ;;  %v1402_v48 = vpop.f32.mrb[7].mxu1  ;;  %v670_v13 = vmul.f32 %v2156_v5, %v2156_v5  ;;  %v678_v24 = vmul.f32 %v2168_v15, %v2168_v15 }
 0x159   : > { %v1379_v49 = vadd.f32 %v1378_v47, %v1377_v45  ;;  %v1403_v50 = vadd.f32 %v1402_v48, %v1401_v46 }
 0x15b   : > { %v1380_v53 = vpop.f32.mrb[8].mxu0  ;;  %v1404_v54 = vpop.f32.mrb[8].mxu1  ;;  %v542_v1 = vsel %vm538_vm0, %v1379_v49, 0.0  ;;  %v550_v10 = vsel %vm538_vm0, %v1403_v50, 0.0  ;;  %v2164_v14 = vsel %vm587_vm1, %v1379_v49, 0.0  ;;  %v2176_v25 = vsel %vm587_vm1, %v1403_v50, 0.0 }
 0x15c   : > { %702 = vadd.xlane.f32.xlu1 %v677_v51  ;;  %700 = vadd.xlane.f32.xlu0 %v676_v52  ;;  %v1381_v55 = vpop.f32.mrb[9].mxu0  ;;  %v1405_v56 = vpop.f32.mrb[9].mxu1  ;;  %v671_v23 = vmul.f32 %v2164_v14, %v2164_v14  ;;  %v679_v27 = vmul.f32 %v2176_v25, %v2176_v25 }
 0x15d   : > { %v1382_v58 = vadd.f32 %v1381_v55, %v1380_v53  ;;  %v1406_v59 = vadd.f32 %v1405_v56, %v1404_v54 }
 0x15f   : > { %v1383_v61 = vpop.f32.mrb[10].mxu0  ;;  %v1407_v62 = vpop.f32.mrb[10].mxu1  ;;  %v543_v26 = vsel %vm538_vm0, %v1382_v58, 0.0  ;;  %v551_v29 = vsel %vm538_vm0, %v1406_v59, 0.0  ;;  %v2188_v30 = vsel %vm587_vm1, %v1382_v58, 0.0  ;;  %v2200_v36 = vsel %vm587_vm1, %v1406_v59, 0.0 }
 0x160   : > { %559 = vadd.xlane.f32.xlu1 %v541_v57  ;;  %557 = vadd.xlane.f32.xlu0 %v540_v60  ;;  %v1384_v63 = vpop.f32.mrb[11].mxu0  ;;  %v1408_v0 = vpop.f32.mrb[11].mxu1  ;;  %v672_v32 = vmul.f32 %v2188_v30, %v2188_v30  ;;  %v680_v38 = vmul.f32 %v2200_v36, %v2200_v36 }
 0x161   : > { %v1385_v3 = vadd.f32 %v1384_v63, %v1383_v61  ;;  %v1409_v4 = vadd.f32 %v1408_v0, %v1407_v62 }
 0x163   : > { %v1386_v6 = vpop.f32.mrb[12].mxu0  ;;  %v1410_v7 = vpop.f32.mrb[12].mxu1  ;;  %v544_v28 = vsel %vm538_vm0, %v1385_v3, 0.0  ;;  %v552_v31 = vsel %vm538_vm0, %v1409_v4, 0.0  ;;  %v2196_v35 = vsel %vm587_vm1, %v1385_v3, 0.0  ;;  %v2208_v39 = vsel %vm587_vm1, %v1409_v4, 0.0 }
 0x164   : > { %561 = vadd.xlane.f32.xlu1 %v542_v1  ;;  %575 = vadd.xlane.f32.xlu0 %v549_v2  ;;  %v1387_v8 = vpop.f32.mrb[13].mxu0  ;;  %v1411_v9 = vpop.f32.mrb[13].mxu1  ;;  %v673_v37 = vmul.f32 %v2196_v35, %v2196_v35  ;;  %v681_v41 = vmul.f32 %v2208_v39, %v2208_v39 }
 0x165   : > { %v1388_v11 = vadd.f32 %v1387_v8, %v1386_v6  ;;  %v1412_v12 = vadd.f32 %v1411_v9, %v1410_v7 }
 0x167   : > { %v1389_v16 = vpop.f32.mrb[14].mxu0  ;;  %v1413_v18 = vpop.f32.mrb[14].mxu1  ;;  %v545_v40 = vsel %vm538_vm0, %v1388_v11, 0.0  ;;  %v553_v45 = vsel %vm538_vm0, %v1412_v12, 0.0  ;;  %v2220_v46 = vsel %vm587_vm1, %v1388_v11, 0.0  ;;  %v2232_v50 = vsel %vm587_vm1, %v1412_v12, 0.0 }
 0x168   : > { %577 = vadd.xlane.f32.xlu1 %v550_v10  ;;  %688 = vadd.xlane.f32.xlu0 %v670_v13  ;;  %v1390_v19 = vpop.f32.mrb[15].mxu0  ;;  %v1414_v20 = vpop.f32.mrb[15].mxu1  ;;  %v674_v48 = vmul.f32 %v2220_v46, %v2220_v46  ;;  %v682_v52 = vmul.f32 %v2232_v50, %v2232_v50 }
 0x169   : > { %v1391_v21 = vadd.f32 %v1390_v19, %v1389_v16  ;;  %v1415_v22 = vadd.f32 %v1414_v20, %v1413_v18 }
 0x16b   : > { %v546_v42 = vsel %vm538_vm0, %v1391_v21, 0.0  ;;  %v554_v47 = vsel %vm538_vm0, %v1415_v22, 0.0  ;;  %v2228_v49 = vsel %vm587_vm1, %v1391_v21, 0.0  ;;  %v2240_v53 = vsel %vm587_vm1, %v1415_v22, 0.0 }
 0x16c   : > { %690 = vadd.xlane.f32.xlu1 %v671_v23  ;;  %704 = vadd.xlane.f32.xlu0 %v678_v24  ;;  %v675_v51 = vmul.f32 %v2228_v49, %v2228_v49  ;;  %v683_v54 = vmul.f32 %v2240_v53, %v2240_v53 }
 0x170   : > { %706 = vadd.xlane.f32.xlu1 %v679_v27  ;;  %563 = vadd.xlane.f32.xlu0 %v543_v26 }
 0x174   : > { %565 = vadd.xlane.f32.xlu1 %v544_v28  ;;  %579 = vadd.xlane.f32.xlu0 %v551_v29 }
 0x178   : > { %581 = vadd.xlane.f32.xlu1 %v552_v31  ;;  %692 = vadd.xlane.f32.xlu0 %v672_v32 }
 0x17c   : > { %694 = vadd.xlane.f32.xlu1 %v673_v37  ;;  %708 = vadd.xlane.f32.xlu0 %v680_v38 }
 0x180   : > { %710 = vadd.xlane.f32.xlu1 %v681_v41  ;;  %567 = vadd.xlane.f32.xlu0 %v545_v40 }
 0x184   : > { %569 = vadd.xlane.f32.xlu1 %v546_v42  ;;  %583 = vadd.xlane.f32.xlu0 %v553_v45 }
 0x188   : > { %585 = vadd.xlane.f32.xlu1 %v554_v47  ;;  %696 = vadd.xlane.f32.xlu0 %v674_v48 }
 0x18c   : > { %698 = vadd.xlane.f32.xlu1 %v675_v51  ;;  %712 = vadd.xlane.f32.xlu0 %v682_v52 }
 0x190   : > { %714 = vadd.xlane.f32.xlu1 %v683_v54 }
 0x1dd   : > { %v556_v55 = vpop.xlane.xlu0 %555 }
 0x1de   : > { %v620_v58 = vmax.f32 %v556_v55, 1e-10  ;;  %v636_v59 = vmin.f32 %v556_v55, -1e-10  ;;  %vm604_vm2 = vcmp.ge.f32.partialorder %v556_v55, 0.0 }
 0x1e0   : > { %v2248_v1 = vsel %vm604_vm2, %v620_v58, %v636_v59 }
 0x1e1   : > { %v574_v56 = vpop.xlane.xlu1 %573  ;;  %v572_v57 = vpop.xlane.xlu0 %571  ;;  %v828_v4 = vand.u32 2147483647, %v2248_v1 }
 0x1e2   : > { %v629_v60 = vmax.f32 %v574_v56, 1e-10  ;;  %v645_v61 = vmin.f32 %v574_v56, -1e-10  ;;  %vm613_vm3 = vcmp.ge.f32.partialorder %v574_v56, 0.0  ;;  %vm612_vm4 = vcmp.ge.f32.partialorder %v572_v57, 0.0 }
 0x1e3   : > { %v628_v62 = vmax.f32 %v572_v57, 1e-10  ;;  %v644_v63 = vmin.f32 %v572_v57, -1e-10 }
 0x1e4   : > { %v2251_v2 = vsel %vm613_vm3, %v629_v60, %v645_v61 }
 0x1e5   : > { %v2244_v17 = vpop.xlane.xlu1 %686  ;;  %v2246_v0 = vpop.xlane.xlu0 %684  ;;  %v2253_v3 = vsel %vm612_vm4, %v628_v62, %v644_v63  ;;  %v837_v8 = vand.u32 2147483647, %v2251_v2 }
 0x1e6   : > { %1537 = vrsqrt.f32 %v2244_v17  ;;  %v836_v9 = vand.u32 2147483647, %v2253_v3  ;;  %vm725_vm7 = vcmp.eq.f32.partialorder %v2244_v17, inf  ;;  %vm718_vm8 = vcmp.eq.f32.partialorder %v2246_v0, inf }
 0x1e7   : > { %1539 = vrsqrt.f32 %v2246_v0  ;;  %vm720_vm9 = vcmp.eq.f32.partialorder %v2246_v0, 0.0  ;;  %v721_v20 = vand.u32 2147483648, %v2246_v0  ;;  %vm727_vm14 = vcmp.eq.f32.partialorder %v2244_v17, 0.0 }
 0x1e9   : > { %v2257_v6 = vpop.xlane.xlu1 %702  ;;  %v2259_v7 = vpop.xlane.xlu0 %700 }
 0x1ea   : > { %1541 = vrsqrt.f32 %v2257_v6  ;;  %vm781_vm10 = vcmp.eq.f32.partialorder %v2257_v6, inf  ;;  %vm783_vm11 = vcmp.eq.f32.partialorder %v2257_v6, 0.0  ;;  %v784_v21 = vand.u32 2147483648, %v2257_v6 }
 0x1eb   : > { %1543 = vrsqrt.f32 %v2259_v7  ;;  %vm774_vm15 = vcmp.eq.f32.partialorder %v2259_v7, inf  ;;  %vm776_vm0 = vcmp.eq.f32.partialorder %v2259_v7, 0.0  ;;  %v777_v55 = vand.u32 2147483648, %v2259_v7 }
 0x1ec   : > { %1545 = vrcp.f32 %v828_v4 }
 0x1ed   : > { %v560_v10 = vpop.xlane.xlu1 %559  ;;  %v558_v11 = vpop.xlane.xlu0 %557  ;;  %1547 = vrcp.f32 %v837_v8 }
 0x1ee   : > { %v622_v12 = vmax.f32 %v560_v10, 1e-10  ;;  %v638_v13 = vmin.f32 %v560_v10, -1e-10  ;;  %vm605_vm5 = vcmp.ge.f32.partialorder %v558_v11, 0.0  ;;  %1549 = vrcp.f32 %v836_v9 }
 0x1ef   : > { %vm606_vm6 = vcmp.ge.f32.partialorder %v560_v10, 0.0  ;;  %v621_v16 = vmax.f32 %v558_v11, 1e-10  ;;  %v637_v18 = vmin.f32 %v558_v11, -1e-10 }
 0x1f0   : > { %v1538_v19 = vpop.eup %1537  ;;  %v2274_v26 = vsel %vm606_vm6, %v622_v12, %v638_v13 }
 0x1f1   : > { %v2272_v22 = vsel %vm605_vm5, %v621_v16, %v637_v18  ;;  %v562_v23 = vpop.xlane.xlu1 %561  ;;  %v576_v24 = vpop.xlane.xlu0 %575  ;;  %v724_v31 = vmul.f32 %v1538_v19, %v2244_v17  ;;  %v830_v47 = vand.u32 2147483647, %v2274_v26 }
 0x1f2   : > { %v829_v27 = vand.u32 2147483647, %v2272_v22  ;;  %vm607_vm12 = vcmp.ge.f32.partialorder %v562_v23, 0.0  ;;  %v623_v28 = vmax.f32 %v562_v23, 1e-10  ;;  %v1540_v29 = vpop.eup %1539  ;;  %vm614_vm13 = vcmp.ge.f32.partialorder %v576_v24, 0.0 }
 0x1f3   : > { %v639_v32 = vmin.f32 %v562_v23, -1e-10  ;;  %v630_v37 = vmax.f32 %v576_v24, 1e-10  ;;  %v717_v40 = vmul.f32 %v1540_v29, %v2246_v0  ;;  %v646_v41 = vmin.f32 %v576_v24, -1e-10 }
 0x1f4   : > { %v1542_v38 = vpop.eup %1541  ;;  %1551 = vrcp.f32 %v829_v27  ;;  %v726_v58 = vsel %vm725_vm7, %v2244_v17, %v724_v31 }
 0x1f5   : > { %v1544_v42 = vpop.eup %1543  ;;  %v780_v45 = vmul.f32 %v1542_v38, %v2257_v6  ;;  %v2285_v48 = vsel %vm607_vm12, %v623_v28, %v639_v32  ;;  %v578_v51 = vpop.xlane.xlu1 %577  ;;  %v719_v52 = vsel %vm718_vm8, %v2246_v0, %v717_v40  ;;  %v2293_v56 = vsel %vm614_vm13, %v630_v37, %v646_v41 }
 0x1f6   : > { %v773_v54 = vmul.f32 %v1544_v42, %v2259_v7  ;;  %v1546_v57 = vpop.eup %1545  ;;  %v722_v59 = vsel %vm720_vm9, %v721_v20, %v719_v52  ;;  %v831_v61 = vand.u32 2147483647, %v2285_v48  ;;  %v2304_v62 = vpop.xlane.xlu0 %688  ;;  %v838_v0 = vand.u32 2147483647, %v2293_v56 }
 0x1f7   : > { %v782_v60 = vsel %vm781_vm10, %v2257_v6, %v780_v45  ;;  %v1548_v63 = vpop.eup %1547  ;;  %v845_v4 = vmul.f32 %v1546_v57, %v722_v59  ;;  %1553 = vrcp.f32 %v830_v47  ;;  %v631_v13 = vmax.f32 %v578_v51, 1e-10 }
 0x1f8   : > { %v785_v8 = vsel %vm783_vm11, %v784_v21, %v782_v60  ;;  %v775_v9 = vsel %vm774_vm15, %v2259_v7, %v773_v54  ;;  %v1550_v10 = vpop.eup %1549  ;;  %v647_v19 = vmin.f32 %v578_v51, -1e-10  ;;  %1555 = vrsqrt.f32 %v2304_v62 }
 0x1f9   : > { %v863_v11 = vmul.f32 %v1548_v63, %v785_v8  ;;  %v778_v12 = vsel %vm776_vm0, %v777_v55, %v775_v9  ;;  %v876_v16 = vmax.f32 %v845_v4, 1e-15  ;;  %v2315_v6 = vpop.xlane.xlu1 %690  ;;  %v728_v20 = vand.u32 2147483648, %v2244_v17 }
 0x1fa   : > { %v861_v18 = vmul.f32 %v1550_v10, %v778_v12  ;;  %1557 = vrcp.f32 %v831_v61  ;;  %vm615_vm1 = vcmp.ge.f32.partialorder %v578_v51, 0.0  ;;  %vm732_vm2 = vcmp.eq.f32.partialorder %v2304_v62, inf }
 0x1fb   : > { %v885_v21 = vmax.f32 %v863_v11, 1e-15  ;;  %v2318_v23 = vmin.f32 %v876_v16, 0.999999  ;;  %v1100_v24 = vmul.f32 %v876_v16, %v2248_v1  ;;  %1559 = vrcp.f32 %v838_v0 }
 0x1fc   : > { %v884_v7 = vmax.f32 %v861_v18, 1e-15  ;;  %v729_v29 = vsel %vm727_vm14, %v728_v20, %v726_v58  ;;  %1561 = vrsqrt.f32 %v2315_v6  ;;  %v2332_v1 = vsel %vm615_vm1, %v631_v13, %v647_v19 }
 0x1fd   : > { %v2321_v27 = vmin.f32 %v885_v21, 0.999999  ;;  %v1109_v28 = vmul.f32 %v885_v21, %v2251_v2  ;;  %v908_v32 = vmul.f32 %v2318_v23, %v2318_v23  ;;  %1563 = vrcp.f32 %v1100_v24  ;;  %v2363_v63 = vpop.xlane.xlu1 %706 }
 0x1fe   : > { %v1552_v31 = vpop.eup %1551  ;;  %v2329_v37 = vmin.f32 %v884_v7, 0.999999  ;;  %v1108_v38 = vmul.f32 %v884_v7, %v2253_v3  ;;  %v839_v47 = vand.u32 2147483647, %v2332_v1  ;;  %v2343_v3 = vpop.xlane.xlu0 %704  ;;  %vm734_vm3 = vcmp.eq.f32.partialorder %v2304_v62, 0.0 }
 0x1ff   : > { %v917_v40 = vmul.f32 %v2321_v27, %v2321_v27  ;;  %v847_v2 = vmul.f32 %v1552_v31, %v729_v29  ;;  %v2336_v41 = vsub.f32 1.0, %v908_v32  ;;  %1565 = vrcp.f32 %v1109_v28 }
 0x200   : > { %v916_v17 = vmul.f32 %v2329_v37, %v2329_v37  ;;  %1567 = vrcp.f32 %v1108_v38  ;;  %v735_v59 = vand.u32 2147483648, %v2304_v62  ;;  %vm739_vm4 = vcmp.eq.f32.partialorder %v2315_v6, inf }
 0x201   : > { %v2340_v42 = vsub.f32 1.0, %v917_v40  ;;  %v877_v45 = vmax.f32 %v847_v2, 1e-15  ;;  %1569 = vrsqrt.f32 %v2336_v41  ;;  %v1554_v51 = vpop.eup %1553  ;;  %vm942_vm5 = vcmp.eq.f32.partialorder %v2336_v41, inf }
 0x202   : > { %v1556_v52 = vpop.eup %1555  ;;  %v2348_v54 = vsub.f32 1.0, %v916_v17  ;;  %vm741_vm6 = vcmp.eq.f32.partialorder %v2315_v6, 0.0  ;;  %v742_v61 = vand.u32 2147483648, %v2315_v6  ;;  %vm944_vm7 = vcmp.eq.f32.partialorder %v2336_v41, 0.0  ;;  %v564_v12 = vpop.xlane.xlu0 %563 }
 0x203   : > { %1571 = vrsqrt.f32 %v2340_v42  ;;  %v2350_v55 = vmin.f32 %v877_v45, 0.999999  ;;  %v731_v58 = vmul.f32 %v1556_v52, %v2304_v62  ;;  %v945_v8 = vand.u32 2147483648, %v2336_v41 }
 0x204   : > { %1573 = vrsqrt.f32 %v2343_v3  ;;  %v1558_v57 = vpop.eup %1557  ;;  %vm1005_vm8 = vcmp.eq.f32.partialorder %v2340_v42, inf  ;;  %vm1007_vm9 = vcmp.eq.f32.partialorder %v2340_v42, 0.0  ;;  %v1008_v16 = vand.u32 2147483648, %v2340_v42 }
 0x205   : > { %1575 = vrcp.f32 %v839_v47  ;;  %v2357_v60 = vpop.eup %1559  ;;  %v909_v9 = vmul.f32 %v2350_v55, %v2350_v55  ;;  %v733_v0 = vsel %vm732_vm2, %v2304_v62, %v731_v58  ;;  %v1101_v21 = vmul.f32 %v877_v45, %v2272_v22  ;;  %v2408_v58 = vpop.xlane.xlu1 %565 }
 0x206   : > { %1577 = vrsqrt.f32 %v2348_v54  ;;  %v1562_v4 = vpop.eup %1561  ;;  %v736_v10 = vsel %vm734_vm3, %v735_v59, %v733_v0  ;;  %vm788_vm10 = vcmp.eq.f32.partialorder %v2343_v3, inf  ;;  %vm790_vm11 = vcmp.eq.f32.partialorder %v2343_v3, 0.0 }
 0x207   : > { %v738_v11 = vmul.f32 %v1562_v4, %v2315_v6  ;;  %v2377_v13 = vpop.eup %1563  ;;  %v2380_v18 = vsub.f32 1.0, %v909_v9  ;;  %v2382_v19 = vmul.f32 %v1554_v51, %v736_v10  ;;  %1579 = vrsqrt.f32 %v2363_v63 }
 0x208   : > { %v791_v7 = vand.u32 2147483648, %v2343_v3  ;;  %v624_v28 = vmax.f32 %v564_v12, 1e-10  ;;  %v640_v29 = vmin.f32 %v564_v12, -1e-10  ;;  %vm998_vm12 = vcmp.eq.f32.partialorder %v2348_v54, inf }
 0x209   : > { %v2385_v20 = vpop.eup %1565  ;;  %v740_v62 = vsel %vm739_vm4, %v2315_v6, %v738_v11  ;;  %1581 = vrsqrt.f32 %v2380_v18  ;;  %v878_v22 = vmax.f32 %v2382_v19, 1e-15  ;;  %vm608_vm13 = vcmp.ge.f32.partialorder %v564_v12, 0.0 }
 0x20a   : > { %v2393_v24 = vpop.eup %1567  ;;  %v743_v32 = vsel %vm741_vm6, %v742_v61, %v740_v62  ;;  %vm1000_vm14 = vcmp.eq.f32.partialorder %v2348_v54, 0.0  ;;  %v1001_v2 = vand.u32 2147483648, %v2348_v54  ;;  %1583 = vrcp.f32 %v1101_v21 }
 0x20b   : > { %v1570_v31 = vpop.eup %1569  ;;  %v851_v17 = vmul.f32 %v1558_v57, %v743_v32  ;;  %v2405_v51 = vmin.f32 %v878_v22, 0.999999  ;;  %v798_v52 = vand.u32 2147483648, %v2363_v63  ;;  %vm795_vm15 = vcmp.eq.f32.partialorder %v2363_v63, inf }
 0x20c   : > { %v941_v40 = vmul.f32 %v1570_v31, %v2336_v41  ;;  %v2416_v57 = vsel %vm608_vm13, %v624_v28, %v640_v29  ;;  %vm949_vm0 = vcmp.eq.f32.partialorder %v2380_v18, inf  ;;  %vm797_vm1 = vcmp.eq.f32.partialorder %v2363_v63, 0.0  ;;  %v2439_v31 = vpop.xlane.xlu0 %579 }
 0x20d   : > { %v1572_v38 = vpop.eup %1571  ;;  %v879_v61 = vmax.f32 %v851_v17, 1e-15  ;;  %v910_v11 = vmul.f32 %v2405_v51, %v2405_v51  ;;  %vm609_vm2 = vcmp.ge.f32.partialorder %v2408_v58, 0.0  ;;  %v832_v29 = vand.u32 2147483647, %v2416_v57 }
 0x20e   : > { %v1574_v45 = vpop.eup %1573  ;;  %v1004_v47 = vmul.f32 %v1572_v38, %v2340_v42  ;;  %v943_v59 = vsel %vm942_vm5, %v2336_v41, %v941_v40  ;;  %vm951_vm3 = vcmp.eq.f32.partialorder %v2380_v18, 0.0  ;;  %v952_v17 = vand.u32 2147483648, %v2380_v18 }
 0x20f   : > { %v1576_v6 = vpop.eup %1575  ;;  %v787_v4 = vmul.f32 %v1574_v45, %v2343_v3  ;;  %v946_v0 = vsel %vm944_vm7, %v945_v8, %v943_v59  ;;  %v2430_v62 = vmin.f32 %v879_v61, 0.999999  ;;  %v2433_v8 = vsub.f32 1.0, %v910_v11 }
 0x210   : > { %v1578_v9 = vpop.eup %1577  ;;  %v1006_v10 = vsel %vm1005_vm8, %v2340_v42, %v1004_v47  ;;  %v1052_v19 = vadd.f32 1.0, %v946_v0  ;;  %v1102_v59 = vmul.f32 %v878_v22, %v2274_v26  ;;  %vm616_vm4 = vcmp.ge.f32.partialorder %v2439_v31, 0.0 }
 0x211   : > { %v1009_v12 = vsel %vm1007_vm9, %v1008_v16, %v1006_v10  ;;  %v997_v21 = vmul.f32 %v1578_v9, %v2348_v54  ;;  %v789_v28 = vsel %vm788_vm10, %v2343_v3, %v787_v4  ;;  %v1580_v32 = vpop.eup %1579  ;;  %v911_v16 = vmul.f32 %v2430_v62, %v2430_v62  ;;  %v2471_v10 = vpop.xlane.xlu0 %692 }
 0x212   : > { %v1061_v41 = vadd.f32 1.0, %v1009_v12  ;;  %1585 = vrcp.f32 %v1052_v19  ;;  %v792_v38 = vsel %vm790_vm11, %v791_v7, %v789_v28  ;;  %v794_v7 = vmul.f32 %v1580_v32, %v2363_v63 }
 0x213   : > { %v999_v42 = vsel %vm998_vm12, %v2348_v54, %v997_v21  ;;  %v1582_v45 = vpop.eup %1581  ;;  %v2454_v4 = vsub.f32 1.0, %v911_v16  ;;  %v865_v3 = vmul.f32 %v2357_v60, %v792_v38  ;;  %v625_v54 = vmax.f32 %v2408_v58, 1e-10 }
 0x214   : > { %1587 = vrcp.f32 %v1061_v41  ;;  %v1002_v40 = vsel %vm1000_vm14, %v1001_v2, %v999_v42  ;;  %v948_v9 = vmul.f32 %v1582_v45, %v2380_v18  ;;  %v641_v2 = vmin.f32 %v2408_v58, -1e-10  ;;  %v2462_v0 = vpop.eup %1583 }
 0x215   : > { %v1060_v47 = vadd.f32 1.0, %v1002_v40  ;;  %1589 = vrsqrt.f32 %v2433_v8  ;;  %v886_v22 = vmax.f32 %v865_v3, 1e-15  ;;  %v796_v60 = vsel %vm795_vm15, %v2363_v63, %v794_v7 }
 0x216   : > { %1591 = vrcp.f32 %v832_v29  ;;  %v950_v26 = vsel %vm949_vm0, %v2380_v18, %v948_v9  ;;  %v1103_v19 = vmul.f32 %v879_v61, %v2285_v48  ;;  %v799_v12 = vsel %vm797_vm1, %v798_v52, %v796_v60  ;;  %v582_v61 = vpop.xlane.xlu1 %581 }
 0x217   : > { %1593 = vrcp.f32 %v1060_v47  ;;  %v953_v11 = vsel %vm951_vm3, %v952_v17, %v950_v26  ;;  %vm956_vm5 = vcmp.eq.f32.partialorder %v2433_v8, inf  ;;  %v2479_v41 = vmin.f32 %v886_v22, 0.999999 }
 0x218   : > { %1595 = vrsqrt.f32 %v2454_v4  ;;  %v1053_v21 = vadd.f32 1.0, %v953_v11  ;;  %v867_v28 = vmul.f32 %v1576_v6, %v799_v12  ;;  %vm958_vm6 = vcmp.eq.f32.partialorder %v2433_v8, 0.0 }
 0x219   : > { %1597 = vrcp.f32 %v1102_v59  ;;  %v959_v29 = vand.u32 2147483648, %v2433_v8  ;;  %v1110_v18 = vmul.f32 %v886_v22, %v2293_v56  ;;  %v918_v48 = vmul.f32 %v2479_v41, %v2479_v41 }
 0x21a   : > { %1599 = vrsqrt.f32 %v2471_v10  ;;  %v887_v63 = vmax.f32 %v867_v28, 1e-15  ;;  %v2489_v52 = vsel %vm609_vm2, %v625_v54, %v641_v2  ;;  %vm963_vm7 = vcmp.eq.f32.partialorder %v2454_v4, inf }
 0x21b   : > { %1601 = vrcp.f32 %v1053_v21  ;;  %v632_v32 = vmax.f32 %v2439_v31, 1e-10  ;;  %v648_v56 = vmin.f32 %v2439_v31, -1e-10  ;;  %vm965_vm8 = vcmp.eq.f32.partialorder %v2454_v4, 0.0 }
 0x21c   : > { %v1586_v6 = vpop.eup %1585  ;;  %1603 = vrcp.f32 %v1103_v19  ;;  %v2497_v38 = vsub.f32 1.0, %v918_v48  ;;  %v2499_v58 = vmin.f32 %v887_v63, 0.999999  ;;  %v833_v45 = vand.u32 2147483647, %v2489_v52 }
 0x21d   : > { %v1069_v16 = vmul.f32 %v1586_v6, %v2318_v23  ;;  %1605 = vrcp.f32 %v1110_v18  ;;  %vm617_vm9 = vcmp.ge.f32.partialorder %v582_v61, 0.0  ;;  %v633_v23 = vmax.f32 %v582_v61, 1e-10  ;;  %v2547_v18 = vpop.xlane.xlu0 %708 }
 0x21e   : > { %v1588_v42 = vpop.eup %1587  ;;  %1607 = vrsqrt.f32 %v2497_v38  ;;  %v2513_v54 = vsel %vm616_vm4, %v632_v32, %v648_v56  ;;  %v649_v2 = vmin.f32 %v582_v61, -1e-10  ;;  %v1111_v11 = vmul.f32 %v887_v63, %v2332_v1 }
 0x21f   : > { %v1590_v40 = vpop.eup %1589  ;;  %v1087_v17 = vmul.f32 %v1588_v42, %v2321_v27  ;;  %v1117_v59 = vmul.f32 %v2377_v13, %v1069_v16  ;;  %v919_v27 = vmul.f32 %v2499_v58, %v2499_v58  ;;  %1609 = vrcp.f32 %v833_v45 }
 0x220   : > { %v2503_v47 = vpop.eup %1591  ;;  %v955_v9 = vmul.f32 %v1590_v40, %v2433_v8  ;;  %vm746_vm10 = vcmp.eq.f32.partialorder %v2471_v10, inf  ;;  %v840_v6 = vand.u32 2147483647, %v2513_v54  ;;  %vm1012_vm11 = vcmp.eq.f32.partialorder %v2497_v38, inf }
 0x221   : > { %v1594_v3 = vpop.eup %1593  ;;  %v1135_v7 = vmul.f32 %v2385_v20, %v1087_v17  ;;  %v1148_v13 = vmul.f32 %v1117_v59, %v2128_v34  ;;  %v2527_v21 = vsub.f32 1.0, %v919_v27  ;;  %v2529_v34 = vpop.xlane.xlu1 %694  ;;  %vm748_vm12 = vcmp.eq.f32.partialorder %v2471_v10, 0.0 }
 0x222   : > { %v1596_v26 = vpop.eup %1595  ;;  %v1085_v22 = vmul.f32 %v1594_v3, %v2329_v37  ;;  %v957_v60 = vsel %vm956_vm5, %v2433_v8, %v955_v9  ;;  %vm1014_vm13 = vcmp.eq.f32.partialorder %v2497_v38, 0.0  ;;  %v1015_v59 = vand.u32 2147483648, %v2497_v38 }
 0x223   : > { %v2521_v20 = vpop.eup %1597  ;;  %v1157_v19 = vmul.f32 %v1135_v7, %v2136_v43  ;;  %v960_v31 = vsel %vm958_vm6, %v959_v29, %v957_v60  ;;  %v962_v12 = vmul.f32 %v1596_v26, %v2454_v4  ;;  %1164 = vst [vmem:[%s2533_s18] sm:$0xff] %v1148_v13  ;;  %v966_v43 = vand.u32 2147483648, %v2454_v4  ;;  %v568_v7 = vpop.xlane.xlu0 %567 }
 0x224   : > { %v1133_v37 = vmul.f32 %v2393_v24, %v1085_v22  ;;  %v1054_v1 = vadd.f32 1.0, %v960_v31  ;;  %v1600_v8 = vpop.eup %1599  ;;  %1611 = vrsqrt.f32 %v2527_v21  ;;  %v2544_v29 = vsel %vm617_vm9, %v633_v23, %v649_v2 }
 0x225   : > { %1173 = vst [vmem:[%s2533_s18 + $0x48] sm:$0xff] %v1157_v19  ;;  %v964_v28 = vsel %vm963_vm7, %v2454_v4, %v962_v12  ;;  %v1602_v24 = vpop.eup %1601  ;;  %v745_v42 = vmul.f32 %v1600_v8, %v2471_v10  ;;  %v841_v16 = vand.u32 2147483647, %v2544_v29  ;;  %v2569_v17 = vpop.xlane.xlu1 %710  ;;  %vm1019_vm14 = vcmp.eq.f32.partialorder %v2527_v21, inf }
 0x226   : > { %v1156_v48 = vmul.f32 %v1133_v37, %v2140_v44  ;;  %1613 = vrcp.f32 %v1054_v1  ;;  %v967_v63 = vsel %vm965_vm8, %v966_v43, %v964_v28  ;;  %v2553_v32 = vpop.eup %1603  ;;  %v1071_v56 = vmul.f32 %v1602_v24, %v2350_v55 }
 0x227   : > { %v1055_v61 = vadd.f32 1.0, %v967_v63  ;;  %1615 = vrcp.f32 %v1111_v11  ;;  %v749_v44 = vand.u32 2147483648, %v2471_v10  ;;  %v2562_v4 = vpop.eup %1605  ;;  %v747_v55 = vsel %vm746_vm10, %v2471_v10, %v745_v42 }
 0x228   : > { %1172 = vst [vmem:[%s2533_s18 + $0x40] sm:$0xff] %v1156_v48  ;;  %1617 = vrsqrt.f32 %v2529_v34  ;;  %v1119_v40 = vmul.f32 %v2462_v0, %v1071_v56  ;;  %v1608_v45 = vpop.eup %1607  ;;  %vm1021_vm15 = vcmp.eq.f32.partialorder %v2527_v21, 0.0  ;;  %v1022_v10 = vand.u32 2147483648, %v2527_v21  ;;  %v584_v56 = vpop.xlane.xlu0 %583 }
 0x229   : > { %1619 = vrcp.f32 %v1055_v61  ;;  %v750_v9 = vsel %vm748_vm12, %v749_v44, %v747_v55  ;;  %v1011_v23 = vmul.f32 %v1608_v45, %v2497_v38  ;;  %vm753_vm0 = vcmp.eq.f32.partialorder %v2529_v34, inf  ;;  %v1610_v2 = vpop.eup %1609  ;;  %v570_v31 = vpop.xlane.xlu1 %569 }
 0x22a   : > { %1621 = vrsqrt.f32 %v2547_v18  ;;  %v1149_v0 = vmul.f32 %v1119_v40, %v2124_v33  ;;  %v853_v3 = vmul.f32 %v2503_v47, %v750_v9  ;;  %vm755_vm1 = vcmp.eq.f32.partialorder %v2529_v34, 0.0 }
 0x22b   : > { %1623 = vrcp.f32 %v840_v6  ;;  %v1013_v27 = vsel %vm1012_vm11, %v2497_v38, %v1011_v23  ;;  %v626_v26 = vmax.f32 %v568_v7, 1e-10  ;;  %v642_v13 = vmin.f32 %v568_v7, -1e-10 }
 0x22c   : > { %1625 = vrsqrt.f32 %v2569_v17  ;;  %1165 = vst [vmem:[%s2533_s18 + $0x8] sm:$0xff] %v1149_v0  ;;  %v880_v33 = vmax.f32 %v853_v3, 1e-15  ;;  %v1016_v47 = vsel %vm1014_vm13, %v1015_v59, %v1013_v27  ;;  %v756_v19 = vand.u32 2147483648, %v2529_v34 }
 0x22d   : > { %1627 = vrcp.f32 %v841_v16  ;;  %v1062_v60 = vadd.f32 1.0, %v1016_v47  ;;  %vm610_vm2 = vcmp.ge.f32.partialorder %v568_v7, 0.0  ;;  %vm802_vm3 = vcmp.eq.f32.partialorder %v2547_v18, inf }
 0x22e   : > { %v1612_v22 = vpop.eup %1611  ;;  %v2589_v11 = vmin.f32 %v880_v33, 0.999999  ;;  %v805_v38 = vand.u32 2147483648, %v2547_v18  ;;  %vm809_vm4 = vcmp.eq.f32.partialorder %v2569_v17, inf  ;;  %vm804_vm5 = vcmp.eq.f32.partialorder %v2547_v18, 0.0 }
 0x22f   : > { %v1018_v37 = vmul.f32 %v1612_v22, %v2527_v21  ;;  %1629 = vrcp.f32 %v1062_v60  ;;  %vm811_vm6 = vcmp.eq.f32.partialorder %v2569_v17, 0.0  ;;  %v812_v28 = vand.u32 2147483648, %v2569_v17 }
 0x230   : > { %v1614_v12 = vpop.eup %1613  ;;  %v912_v8 = vmul.f32 %v2589_v11, %v2589_v11  ;;  %v2608_v63 = vsel %vm610_vm2, %v626_v26, %v642_v13  ;;  %v627_v6 = vmax.f32 %v570_v31, 1e-10  ;;  %v1104_v9 = vmul.f32 %v880_v33, %v2416_v57 }
 0x231   : > { %v2596_v1 = vpop.eup %1615  ;;  %v1073_v43 = vmul.f32 %v1614_v12, %v2405_v51  ;;  %v1020_v48 = vsel %vm1019_vm14, %v2527_v21, %v1018_v37  ;;  %v643_v51 = vmin.f32 %v570_v31, -1e-10  ;;  %vm611_vm7 = vcmp.ge.f32.partialorder %v570_v31, 0.0  ;;  %v586_v21 = vpop.xlane.xlu1 %585 }
 0x232   : > { %v1618_v24 = vpop.eup %1617  ;;  %v1023_v16 = vsel %vm1021_vm15, %v1022_v10, %v1020_v48  ;;  %v2613_v44 = vsub.f32 1.0, %v912_v8  ;;  %vm618_vm8 = vcmp.ge.f32.partialorder %v584_v56, 0.0  ;;  %v634_v57 = vmax.f32 %v584_v56, 1e-10 }
 0x233   : > { %v1620_v61 = vpop.eup %1619  ;;  %v1121_v42 = vmul.f32 %v2521_v20, %v1073_v43  ;;  %v752_v40 = vmul.f32 %v1618_v24, %v2529_v34  ;;  %v1063_v59 = vadd.f32 1.0, %v1023_v16  ;;  %v834_v20 = vand.u32 2147483647, %v2608_v63 }
 0x234   : > { %v1622_v55 = vpop.eup %1621  ;;  %v1075_v45 = vmul.f32 %v1620_v61, %v2430_v62  ;;  %1631 = vrsqrt.f32 %v2613_v44  ;;  %v2631_v47 = vsel %vm611_vm7, %v627_v6, %v643_v51  ;;  %v650_v13 = vmin.f32 %v584_v56, -1e-10 }
 0x235   : > { %v1624_v0 = vpop.eup %1623  ;;  %v1150_v23 = vmul.f32 %v1121_v42, %v2156_v5  ;;  %1633 = vrcp.f32 %v1063_v59  ;;  %v754_v62 = vsel %vm753_vm0, %v2529_v34, %v752_v40  ;;  %v801_v27 = vmul.f32 %v1622_v55, %v2547_v18 }
 0x236   : > { %v1626_v3 = vpop.eup %1625  ;;  %v1123_v7 = vmul.f32 %v2553_v32, %v1075_v45  ;;  %v757_v5 = vsel %vm755_vm1, %v756_v19, %v754_v62  ;;  %vm619_vm9 = vcmp.ge.f32.partialorder %v586_v21, 0.0  ;;  %v635_v60 = vmax.f32 %v586_v21, 1e-10 }
 0x237   : > { %v1628_v10 = vpop.eup %1627  ;;  %1166 = vst [vmem:[%s2533_s18 + $0x10] sm:$0xff] %v1150_v23  ;;  %v808_v33 = vmul.f32 %v1626_v3, %v2569_v17  ;;  %v855_v26 = vmul.f32 %v1610_v2, %v757_v5  ;;  %v803_v22 = vsel %vm802_vm3, %v2547_v18, %v801_v27  ;;  %v651_v19 = vmin.f32 %v586_v21, -1e-10  ;;  %v2681_v21 = vpop.xlane.xlu1 %698 }
 0x238   : > { %v1151_v32 = vmul.f32 %v1123_v7, %v2164_v14  ;;  %v806_v31 = vsel %vm804_vm5, %v805_v38, %v803_v22  ;;  %v2646_v2 = vsel %vm618_vm8, %v634_v57, %v650_v13  ;;  %1635 = vrcp.f32 %v1104_v9 }
 0x239   : > { %v810_v34 = vsel %vm809_vm4, %v2569_v17, %v808_v33  ;;  %v881_v12 = vmax.f32 %v855_v26, 1e-15  ;;  %v1630_v37 = vpop.eup %1629  ;;  %v869_v43 = vmul.f32 %v1624_v0, %v806_v31  ;;  %v835_v24 = vand.u32 2147483647, %v2631_v47 }
 0x23a   : > { %1167 = vst [vmem:[%s2533_s18 + $0x18] sm:$0xff] %v1151_v32  ;;  %v813_v14 = vsel %vm811_vm6, %v812_v28, %v810_v34  ;;  %v1089_v48 = vmul.f32 %v1630_v37, %v2479_v41  ;;  %1637 = vrcp.f32 %v834_v20  ;;  %v842_v38 = vand.u32 2147483647, %v2646_v2  ;;  %v2674_v20 = vpop.xlane.xlu0 %696 }
 0x23b   : > { %v871_v8 = vmul.f32 %v1628_v10, %v813_v14  ;;  %v2650_v6 = vmin.f32 %v881_v12, 0.999999  ;;  %v888_v51 = vmax.f32 %v869_v43, 1e-15  ;;  %v2654_v17 = vsel %vm619_vm9, %v635_v60, %v651_v19  ;;  %v2695_v33 = vpop.xlane.xlu1 %714 }
 0x23c   : > { %v1137_v28 = vmul.f32 %v2562_v4, %v1089_v48  ;;  %vm970_vm10 = vcmp.eq.f32.partialorder %v2613_v44, inf  ;;  %v973_v56 = vand.u32 2147483648, %v2613_v44  ;;  %v1105_v42 = vmul.f32 %v881_v12, %v2489_v52 }
 0x23d   : > { %v889_v18 = vmax.f32 %v871_v8, 1e-15  ;;  %v913_v61 = vmul.f32 %v2650_v6, %v2650_v6  ;;  %v2662_v16 = vmin.f32 %v888_v51, 0.999999  ;;  %1639 = vrcp.f32 %v835_v24 }
 0x23e   : > { %v1632_v41 = vpop.eup %1631  ;;  %v1158_v45 = vmul.f32 %v1137_v28, %v2168_v15  ;;  %v843_v9 = vand.u32 2147483647, %v2654_v17  ;;  %1641 = vrcp.f32 %v842_v38  ;;  %vm972_vm11 = vcmp.eq.f32.partialorder %v2613_v44, 0.0 }
 0x23f   : > { %v2664_v40 = vmin.f32 %v889_v18, 0.999999  ;;  %v1634_v55 = vpop.eup %1633  ;;  %v969_v4 = vmul.f32 %v1632_v41, %v2613_v44  ;;  %v929_v59 = vsub.f32 1.0, %v913_v61  ;;  %v920_v23 = vmul.f32 %v2662_v16, %v2662_v16 }
 0x240   : > { %v1091_v0 = vmul.f32 %v1634_v55, %v2499_v58  ;;  %1174 = vst [vmem:[%s2533_s18 + $0x50] sm:$0xff] %v1158_v45  ;;  %v2705_v13 = vmul.f32 %v889_v18, %v2544_v29  ;;  %vm760_vm12 = vcmp.eq.f32.partialorder %v2674_v20, inf  ;;  %vm762_vm15 = vcmp.eq.f32.partialorder %v2674_v20, 0.0 }
 0x241   : > { %v921_v52 = vmul.f32 %v2664_v40, %v2664_v40  ;;  %v971_v15 = vsel %vm970_vm10, %v2613_v44, %v969_v4  ;;  %1643 = vrsqrt.f32 %v929_v59  ;;  %v936_v7 = vsub.f32 1.0, %v920_v23  ;;  %v2691_v44 = vpop.xlane.xlu0 %712 }
 0x242   : > { %v1139_v58 = vmul.f32 %v2596_v1, %v1091_v0  ;;  %v974_v3 = vsel %vm972_vm11, %v973_v56, %v971_v15  ;;  %1645 = vrcp.f32 %v1105_v42  ;;  %v1636_v10 = vpop.eup %1635  ;;  %v1112_v1 = vmul.f32 %v888_v51, %v2513_v54 }
 0x243   : > { %v1056_v62 = vadd.f32 1.0, %v974_v3  ;;  %v2684_v57 = vsub.f32 1.0, %v921_v52  ;;  %1647 = vrcp.f32 %v843_v9  ;;  %vm977_vm13 = vcmp.eq.f32.partialorder %v929_v59, inf }
 0x244   : > { %v1159_v5 = vmul.f32 %v1139_v58, %v2176_v25  ;;  %1649 = vrsqrt.f32 %v936_v7  ;;  %v2687_v27 = vpop.eup %1637  ;;  %vm979_vm14 = vcmp.eq.f32.partialorder %v929_v59, 0.0  ;;  %v980_v34 = vand.u32 2147483648, %v929_v59 }
 0x245   : > { %1651 = vrcp.f32 %v1056_v62  ;;  %vm1026_vm0 = vcmp.eq.f32.partialorder %v936_v7, inf  ;;  %vm1028_vm1 = vcmp.eq.f32.partialorder %v936_v7, 0.0  ;;  %v1029_v19 = vand.u32 2147483648, %v936_v7 }
 0x246   : > { %1175 = vst [vmem:[%s2533_s18 + $0x58] sm:$0xff] %v1159_v5  ;;  %1653 = vrsqrt.f32 %v2684_v57  ;;  %v763_v12 = vand.u32 2147483648, %v2674_v20  ;;  %vm1033_vm2 = vcmp.eq.f32.partialorder %v2684_v57, inf  ;;  %vm1035_vm3 = vcmp.eq.f32.partialorder %v2684_v57, 0.0 }
 0x247   : > { %1655 = vrsqrt.f32 %v2674_v20  ;;  %v2697_v32 = vpop.eup %1639  ;;  %v1036_v14 = vand.u32 2147483648, %v2684_v57  ;;  %vm767_vm4 = vcmp.eq.f32.partialorder %v2681_v21, inf  ;;  %vm769_vm5 = vcmp.eq.f32.partialorder %v2681_v21, 0.0 }
 0x248   : > { %1657 = vrsqrt.f32 %v2681_v21  ;;  %v2701_v25 = vpop.eup %1641  ;;  %v770_v18 = vand.u32 2147483648, %v2681_v21  ;;  %vm816_vm6 = vcmp.eq.f32.partialorder %v2691_v44, inf  ;;  %vm818_vm7 = vcmp.eq.f32.partialorder %v2691_v44, 0.0 }
 0x249   : > { %1659 = vrsqrt.f32 %v2691_v44  ;;  %v819_v61 = vand.u32 2147483648, %v2691_v44  ;;  %vm823_vm8 = vcmp.eq.f32.partialorder %v2695_v33, inf  ;;  %vm825_vm9 = vcmp.eq.f32.partialorder %v2695_v33, 0.0 }
 0x24a   : > { %1661 = vrsqrt.f32 %v2695_v33 }
 0x24b   : > { %v1644_v26 = vpop.eup %1643  ;;  %1663 = vrcp.f32 %v1112_v1 }
 0x24c   : > { %v2708_v54 = vpop.eup %1645  ;;  %v976_v22 = vmul.f32 %v1644_v26, %v929_v59 }
 0x24d   : > { %v2711_v60 = vpop.eup %1647 }
 0x24e   : > { %v1650_v31 = vpop.eup %1649  ;;  %v978_v29 = vsel %vm977_vm13, %v929_v59, %v976_v22  ;;  %v826_v22 = vand.u32 2147483648, %v2695_v33 }
 0x24f   : > { %v1652_v37 = vpop.eup %1651  ;;  %v981_v43 = vsel %vm979_vm14, %v980_v34, %v978_v29  ;;  %v1025_v8 = vmul.f32 %v1650_v31, %v936_v7 }
 0x250   : > { %v1654_v24 = vpop.eup %1653  ;;  %v1077_v48 = vmul.f32 %v1652_v37, %v2589_v11  ;;  %v1057_v51 = vadd.f32 1.0, %v981_v43 }
 0x251   : > { %v1656_v38 = vpop.eup %1655  ;;  %v1027_v28 = vsel %vm1026_vm0, %v936_v7, %v1025_v8  ;;  %v1032_v56 = vmul.f32 %v1654_v24, %v2684_v57 }
 0x252   : > { %v1658_v41 = vpop.eup %1657  ;;  %v1125_v42 = vmul.f32 %v1636_v10, %v1077_v48  ;;  %1665 = vrcp.f32 %v1057_v51  ;;  %v1030_v55 = vsel %vm1028_vm1, %v1029_v19, %v1027_v28  ;;  %v759_v11 = vmul.f32 %v1656_v38, %v2674_v20 }
 0x253   : > { %v1660_v45 = vpop.eup %1659  ;;  %v1064_v4 = vadd.f32 1.0, %v1030_v55  ;;  %v1034_v59 = vsel %vm1033_vm2, %v2684_v57, %v1032_v56  ;;  %v766_v9 = vmul.f32 %v1658_v41, %v2681_v21 }
 0x254   : > { %v1662_v0 = vpop.eup %1661  ;;  %v1152_v23 = vmul.f32 %v1125_v42, %v2188_v30  ;;  %v1037_v52 = vsel %vm1035_vm3, %v1036_v14, %v1034_v59  ;;  %v761_v15 = vsel %vm760_vm12, %v2674_v20, %v759_v11  ;;  %v815_v58 = vmul.f32 %v1660_v45, %v2691_v44 }
 0x255   : > { %v1664_v3 = vpop.eup %1663  ;;  %1667 = vrcp.f32 %v1064_v4  ;;  %v1065_v7 = vadd.f32 1.0, %v1037_v52  ;;  %v764_v62 = vsel %vm762_vm15, %v763_v12, %v761_v15  ;;  %v768_v10 = vsel %vm767_vm4, %v2681_v21, %v766_v9 }
 0x256   : > { %1168 = vst [vmem:[%s2533_s18 + $0x20] sm:$0xff] %v1152_v23  ;;  %v2747_v30 = vmul.f32 %v2687_v27, %v764_v62  ;;  %v771_v57 = vsel %vm769_vm5, %v770_v18, %v768_v10  ;;  %v817_v5 = vsel %vm816_vm6, %v2691_v44, %v815_v58  ;;  %v822_v1 = vmul.f32 %v1662_v0, %v2695_v33 }
 0x257   : > { %1669 = vrcp.f32 %v1065_v7  ;;  %v2756_v20 = vmul.f32 %v2697_v32, %v771_v57  ;;  %v820_v26 = vsel %vm818_vm7, %v819_v61, %v817_v5 }
 0x258   : > { %v882_v27 = vmax.f32 %v2747_v30, 1e-15  ;;  %v2763_v21 = vmul.f32 %v2701_v25, %v820_v26  ;;  %v824_v34 = vsel %vm823_vm8, %v2695_v33, %v822_v1  ;;  %1671 = vrcp.f32 %v2705_v13 }
 0x259   : > { %v883_v32 = vmax.f32 %v2756_v20, 1e-15  ;;  %v827_v19 = vsel %vm825_vm9, %v826_v22, %v824_v34 }
 0x25a   : > { %v2771_v44 = vmin.f32 %v882_v27, 0.999999  ;;  %v890_v12 = vmax.f32 %v2763_v21, 1e-15  ;;  %v2775_v31 = vmul.f32 %v2711_v60, %v827_v19 }
 0x25b   : > { %v2777_v25 = vmin.f32 %v883_v32, 0.999999  ;;  %v1107_v62 = vmul.f32 %v883_v32, %v2631_v47 }
 0x25c   : > { %v1666_v29 = vpop.eup %1665  ;;  %v914_v14 = vmul.f32 %v2771_v44, %v2771_v44  ;;  %v2783_v33 = vmin.f32 %v890_v12, 0.999999  ;;  %v891_v43 = vmax.f32 %v2775_v31, 1e-15  ;;  %v1114_v20 = vmul.f32 %v890_v12, %v2646_v2 }
 0x25d   : > { %v1079_v13 = vmul.f32 %v1666_v29, %v2650_v6  ;;  %v915_v37 = vmul.f32 %v2777_v25, %v2777_v25 }
 0x25e   : > { %v930_v60 = vsub.f32 1.0, %v914_v14  ;;  %v922_v51 = vmul.f32 %v2783_v33, %v2783_v33  ;;  %v2794_v18 = vmin.f32 %v891_v43, 0.999999  ;;  %v1115_v32 = vmul.f32 %v891_v43, %v2654_v17 }
 0x25f   : > { %v1668_v8 = vpop.eup %1667  ;;  %v1127_v24 = vmul.f32 %v2708_v54, %v1079_v13  ;;  %v931_v48 = vsub.f32 1.0, %v915_v37 }
 0x260   : > { %v1093_v6 = vmul.f32 %v1668_v8, %v2662_v16  ;;  %1673 = vrsqrt.f32 %v930_v60  ;;  %v938_v41 = vsub.f32 1.0, %v922_v51  ;;  %v923_v42 = vmul.f32 %v2794_v18, %v2794_v18 }
 0x261   : > { %v1670_v38 = vpop.eup %1669  ;;  %v1153_v28 = vmul.f32 %v1127_v24, %v2196_v35  ;;  %1675 = vrsqrt.f32 %v931_v48  ;;  %vm984_vm10 = vcmp.eq.f32.partialorder %v930_v60, inf  ;;  %vm986_vm11 = vcmp.eq.f32.partialorder %v930_v60, 0.0 }
 0x262   : > { %v1141_v56 = vmul.f32 %v1664_v3, %v1093_v6  ;;  %v1095_v54 = vmul.f32 %v1670_v38, %v2664_v40  ;;  %v1672_v61 = vpop.eup %1671  ;;  %1677 = vrsqrt.f32 %v938_v41  ;;  %v939_v45 = vsub.f32 1.0, %v923_v42 }
 0x263   : > { %1169 = vst [vmem:[%s2533_s18 + $0x28] sm:$0xff] %v1153_v28  ;;  %v987_v40 = vand.u32 2147483648, %v930_v60  ;;  %vm991_vm12 = vcmp.eq.f32.partialorder %v931_v48, inf  ;;  %v994_v23 = vand.u32 2147483648, %v931_v48  ;;  %vm993_vm13 = vcmp.eq.f32.partialorder %v931_v48, 0.0 }
 0x264   : > { %v1160_v55 = vmul.f32 %v1141_v56, %v2200_v36  ;;  %v1143_v11 = vmul.f32 %v1672_v61, %v1095_v54  ;;  %1679 = vrsqrt.f32 %v939_v45  ;;  %vm1040_vm14 = vcmp.eq.f32.partialorder %v938_v41, inf }
 0x265   : > { %v1043_v30 = vand.u32 2147483648, %v938_v41  ;;  %vm1042_vm15 = vcmp.eq.f32.partialorder %v938_v41, 0.0  ;;  %vm1047_vm0 = vcmp.eq.f32.partialorder %v939_v45, inf  ;;  %v1050_v22 = vand.u32 2147483648, %v939_v45 }
 0x266   : > { %1176 = vst [vmem:[%s2533_s18 + $0x60] sm:$0xff] %v1160_v55  ;;  %v1161_v16 = vmul.f32 %v1143_v11, %v2208_v39  ;;  %v1106_v39 = vmul.f32 %v882_v27, %v2608_v63  ;;  %vm1049_vm1 = vcmp.eq.f32.partialorder %v939_v45, 0.0 }
 0x268   : > { %1177 = vst [vmem:[%s2533_s18 + $0x68] sm:$0xff] %v1161_v16 }
 0x26a   : > { %v1674_v35 = vpop.eup %1673 }
 0x26b   : > { %v1676_v4 = vpop.eup %1675  ;;  %v983_v59 = vmul.f32 %v1674_v35, %v930_v60 }
 0x26c   : > { %v990_v9 = vmul.f32 %v1676_v4, %v931_v48  ;;  %v1678_v15 = vpop.eup %1677 }
 0x26d   : > { %v985_v0 = vsel %vm984_vm10, %v930_v60, %v983_v59  ;;  %v1039_v10 = vmul.f32 %v1678_v15, %v938_v41 }
 0x26e   : > { %v988_v52 = vsel %vm986_vm11, %v987_v40, %v985_v0  ;;  %v992_v36 = vsel %vm991_vm12, %v931_v48, %v990_v9  ;;  %v1680_v57 = vpop.eup %1679 }
 0x26f   : > { %v1058_v58 = vadd.f32 1.0, %v988_v52  ;;  %v995_v3 = vsel %vm993_vm13, %v994_v23, %v992_v36  ;;  %v1041_v5 = vsel %vm1040_vm14, %v938_v41, %v1039_v10  ;;  %v1046_v26 = vmul.f32 %v1680_v57, %v939_v45 }
 0x270   : > { %v1059_v7 = vadd.f32 1.0, %v995_v3  ;;  %v1044_v1 = vsel %vm1042_vm15, %v1043_v30, %v1041_v5 }
 0x271   : > { %1681 = vrcp.f32 %v1058_v58  ;;  %v1066_v63 = vadd.f32 1.0, %v1044_v1  ;;  %v1048_v47 = vsel %vm1047_vm0, %v939_v45, %v1046_v26 }
 0x272   : > { %1683 = vrcp.f32 %v1059_v7  ;;  %v1051_v27 = vsel %vm1049_vm1, %v1050_v22, %v1048_v47 }
 0x273   : > { %1685 = vrcp.f32 %v1106_v39  ;;  %v1067_v34 = vadd.f32 1.0, %v1051_v27 }
 0x274   : > { %1687 = vrcp.f32 %v1107_v62 }
 0x275   : > { %1689 = vrcp.f32 %v1066_v63 }
 0x276   : > { %1691 = vrcp.f32 %v1114_v20 }
 0x277   : > { %1693 = vrcp.f32 %v1067_v34 }
 0x278   : > { %1695 = vrcp.f32 %v1115_v32 }
 0x27b   : > { %v1682_v19 = vpop.eup %1681 }
 0x27c   : > { %v1684_v2 = vpop.eup %1683  ;;  %v1081_v21 = vmul.f32 %v1682_v19, %v2771_v44 }
 0x27d   : > { %v1686_v12 = vpop.eup %1685  ;;  %v1083_v29 = vmul.f32 %v1684_v2, %v2777_v25 }
 0x27e   : > { %v1688_v14 = vpop.eup %1687  ;;  %v1129_v13 = vmul.f32 %v1686_v12, %v1081_v21 }
 0x27f   : > { %v1131_v37 = vmul.f32 %v1688_v14, %v1083_v29  ;;  %v1690_v31 = vpop.eup %1689 }
 0x280   : > { %v1154_v17 = vmul.f32 %v1129_v13, %v2220_v46  ;;  %v1097_v60 = vmul.f32 %v1690_v31, %v2783_v33  ;;  %v1692_v8 = vpop.eup %1691 }
 0x281   : > { %v1155_v43 = vmul.f32 %v1131_v37, %v2228_v49  ;;  %v1694_v44 = vpop.eup %1693 }
 0x282   : > { %1170 = vst [vmem:[%s2533_s18 + $0x30] sm:$0xff] %v1154_v17  ;;  %v1145_v24 = vmul.f32 %v1692_v8, %v1097_v60  ;;  %v1099_v25 = vmul.f32 %v1694_v44, %v2794_v18  ;;  %v1696_v48 = vpop.eup %1695 }
 0x283   : > { %1171 = vst [vmem:[%s2533_s18 + $0x38] sm:$0xff] %v1155_v43 }
 0x284   : > { %v1162_v51 = vmul.f32 %v1145_v24, %v2232_v50  ;;  %v1147_v46 = vmul.f32 %v1696_v48, %v1099_v25 }
 0x286   : > { %1178 = vst [vmem:[%s2533_s18 + $0x70] sm:$0xff] %v1162_v51  ;;  %v1163_v49 = vmul.f32 %v1147_v46, %v2240_v53 }
 0x288   : > { %1179 = vst [vmem:[%s2533_s18 + $0x78] sm:$0xff] %v1163_v49 }
 0x289   : > { %1770 = shalt.err (!%p1767_p9)
}
 0x28a   : > { %s1771_s4 = scalar_lea.hbm %s2829_s26, 2048  ;;  %s1775_s3 = scalar_lea.hbm %s2884_s2, 4096 }
 0x28b   : > { %p1772_p1 = scmp.ne.s32.totalorder %s2829_s26, %s1771_s4  ;;  %p1776_p5 = scmp.lt.u32.totalorder %s2829_s26, %s2884_s2 }
 0x28c   : > { %p1777_p4 = scmp.lt.u32.totalorder %s1775_s3, %s1771_s4  ;;  %p1779_p0 = scmp.lt.u32.totalorder %s1771_s4, %s2829_s26 }
 0x28d   : > { %p1773_p6 = pnand %p1772_p1, %p2895_p3 }
 0x28e   : > { %p1778_p8 = por %p1777_p4, %p1776_p5 }
 0x28f   : > { %p1774_p2 = pneg %p1773_p6 }
 0x290   : > { %p1780_p11 = por %p1779_p0, %p1778_p8 }
 0x292   : > { %p1781_p13 = pnand %p1780_p11, %p1774_p2 }
 0x294   : > { %1784 = shalt.err (!%p1781_p13)
}
 0x295   : > { %s1852_s21 = smov 128   ;;  %s1853_s18 = smov 8  }
 0x296   : > { %1468 = dma.vmem_to_hbm [thread:$0]  (%p2895_p3), %s2831_s28, 2048, %s2829_s26, %s1181_s12, %s1852_s21, %s1852_s21, %s1853_s18  }
 0x297 PF: > { %s1211_s19 = sand.u32 1, %s1823_s9   ;;  %p2896_p7 = scmp.ne.s32.totalorder %s2890_s24, 0 }
 0x298   : > { %p2897_p10 = scmp.ge.s32.totalorder %s1843_s14, 2  ;;  %s1212_s30 = scalar_lea.sflag [#allocation5], %s1211_s19 }
 0x29a   : > { %p1478_p12 = pnand %p2897_p10, %p2896_p7 }
 0x29c   : > { %1818 = dma.done.wait (!%p1478_p12), %s1212_s30, 2048  }
 0x29d   : > { %1820 = vsyncadd (!%p1478_p12), %s1212_s30, 4294965248  ;;  %s21_s14 = sadd.s32 1, %s1843_s14   ;;  %s2898_s9 = smov %s1827_s10 }
 0x29e   : > { %p18_p9 = scmp.ge.s32.totalorder %s21_s14, 4   ;;  %s2899_s10 = smov %s1831_s11 }
 0x29f   : > { %s2900_s11 = smov %s1925_s23  ;;  %s2901_s12 = smov %s1839_s13 }
 0x2a0   : > { %s2902_s13 = smov %s2904_s17  ;;  %20 = sbr.rel (!%p18_p9) target bundleno = 8 (0x8), region = 94 }
 0x2a7   :  { %1217 = vsyncpa [#allocation4], 1 }
 0x2a8   :  { %1219 = vsyncpa [#allocation4 + $0x1], 1 }
 0x2a9   :  { %1220 = vsyncpa [#allocation7], 1 }
 0x2aa   :  { %1222 = vsyncpa [#allocation7 + $0x1], 1 }
 0x2ab   :  { %1223 = vsyncpa [#allocation5], 1 }
 0x2ac   :  { %1225 = vsyncpa [#allocation5 + $0x1], 1 }

</bundles_post_ra>
